<compile_context>
chip_gen: v7x
topology: tpu7x:2x2x1
jax: 0.10.0
libtpu: 0.0.40
codegen_flags: <defaults>
</compile_context>

<pallas_src>
import functools

import jax
import jax.numpy as jnp
from jax import lax
from jax.experimental import pallas as pl
from jax.experimental.pallas import tpu as pltpu

LN_EPS = 1e-5          # torch.nn.LayerNorm default
NEG_BIG = -1e30        # finite "minus infinity" for the causal mask


def _layernorm(x, w, b):
    mu = jnp.mean(x, axis=-1, keepdims=True)
    xc = x - mu
    var = jnp.mean(xc * xc, axis=-1, keepdims=True)
    inv = lax.rsqrt(var + LN_EPS)
    return xc * inv * w + b


# --------------------------------------------------------------------------
# transformer blocks: grid = (B, L); the (1, T, E) output block is resident
# across the L axis and acts as the residual-stream accumulator.
#   out = x + MHA(LN1(x));  out = out + FFN(LN2(out))
# --------------------------------------------------------------------------
def block_kernel(n_heads, heads_dim,
                 x_ref, ln1w_ref, ln1b_ref, wqkv_ref, wo_ref, bo_ref,
                 ln2w_ref, ln2b_ref, w1_ref, b1_ref, w2_ref, b2_ref,
                 out_ref):
    # initialize the residual from the embeddings on the first layer
    @pl.when(pl.program_id(1) == 0)
    def _():
        out_ref[0] = x_ref[0]

    x = out_ref[0]                                        # (T, E) f32 residual
    T = x.shape[0]
    H, Dh = n_heads, heads_dim
    HD = H * Dh

    # ---------------- attention sublayer ----------------
    h = _layernorm(x, ln1w_ref[0], ln1b_ref[0]).astype(jnp.bfloat16)
    # fused QKV projection: one (T, E) @ (E, 3*HD) matmul on the MXU
    qkv = jnp.dot(h, wqkv_ref[0],
                  preferred_element_type=jnp.float32)     # (T, 3*HD) f32
    scale = 1.0 / (heads_dim ** 0.5)
    # fold softmax scale into q; cast each operand to bf16 exactly once
    q = (qkv[:, 0 * HD:1 * HD] * scale).reshape(T, H, Dh).astype(jnp.bfloat16)
    k = qkv[:, 1 * HD:2 * HD].reshape(T, H, Dh).astype(jnp.bfloat16)
    v = qkv[:, 2 * HD:3 * HD].reshape(T, H, Dh).astype(jnp.bfloat16)

    # batched per-head scores without explicit head transposes
    scores = jnp.einsum('thd,shd->hts', q, k,
                        preferred_element_type=jnp.float32)   # (H, T, T) f32

    # causal mask computed once, broadcast across heads; softmax in f32
    row = lax.broadcasted_iota(jnp.int32, (T, T), 0)
    col = lax.broadcasted_iota(jnp.int32, (T, T), 1)
    causal = (col <= row)[None, :, :]
    scores = jnp.where(causal, scores, NEG_BIG)
    scores = scores - jnp.max(scores, axis=-1, keepdims=True)
    p = jnp.exp(scores)
    p = p * pl.reciprocal(jnp.sum(p, axis=-1, keepdims=True), approx=True)

    att = jnp.einsum('hts,shd->thd', p.astype(jnp.bfloat16), v,
                     preferred_element_type=jnp.float32)  # (T, H, Dh)
    att = att.reshape(T, HD).astype(jnp.bfloat16)
    proj = jnp.dot(att, wo_ref[0],
                   preferred_element_type=jnp.float32)    # (T, E)
    x = x + proj + bo_ref[0]

    # ---------------- ffn sublayer ----------------
    h2 = _layernorm(x, ln2w_ref[0], ln2b_ref[0]).astype(jnp.bfloat16)
    h2 = jnp.dot(h2, w1_ref[0],
                 preferred_element_type=jnp.float32) + b1_ref[0]
    h2 = jnp.maximum(h2, 0.0).astype(jnp.bfloat16)
    h2 = jnp.dot(h2, w2_ref[0],
                 preferred_element_type=jnp.float32) + b2_ref[0]
    out_ref[0] = x + h2


def run_blocks(x, stacked, n_heads, heads_dim):
    B, T, E = x.shape
    keys = ("ln1_w", "ln1_b", "wqkv", "wo", "bo",
            "ln2_w", "ln2_b", "w1", "b1", "w2", "b2")
    weights = [stacked[k] for k in keys]
    L = weights[0].shape[0]

    def wspec(w):
        nd = w.ndim
        return pl.BlockSpec((1,) + w.shape[1:],
                            lambda b, l, _nd=nd: (l,) + (0,) * (_nd - 1))

    in_specs = [pl.BlockSpec((1, T, E), lambda b, l: (b, 0, 0))] + \
               [wspec(w) for w in weights]

    # explicit scoped-VMEM budget: double-buffered per-layer weights +
    # resident activations/intermediates, with headroom (clamped 32..100 MiB).
    per_layer_w = sum(int(w.size) // L * w.dtype.itemsize for w in weights)
    act = 4 * T * E * 4 + n_heads * T * T * 4 + T * 4 * E * 4
    vmem_limit = int(min(max(2 * per_layer_w + 2 * act + (8 << 20), 32 << 20),
                         100 << 20))

    return pl.pallas_call(
        functools.partial(block_kernel, n_heads, heads_dim),
        out_shape=jax.ShapeDtypeStruct((B, T, E), jnp.float32),
        grid=(B, L),
        in_specs=in_specs,
        out_specs=pl.BlockSpec((1, T, E), lambda b, l: (b, 0, 0)),
        compiler_params=pltpu.CompilerParams(
            dimension_semantics=("parallel", "arbitrary"),
            vmem_limit_bytes=vmem_limit),
    )(x, *weights)


# --------------------------------------------------------------------------
# final LayerNorm (once per batch element) -> bf16 activations
# --------------------------------------------------------------------------
def final_ln_kernel(x_ref, lnw_ref, lnb_ref, h_ref):
    h_ref[0] = _layernorm(x_ref[0], lnw_ref[...], lnb_ref[...]).astype(jnp.bfloat16)


def run_final_ln(x, lnw, lnb):
    B, T, E = x.shape
    return pl.pallas_call(
        final_ln_kernel,
        out_shape=jax.ShapeDtypeStruct((B, T, E), jnp.bfloat16),
        grid=(B,),
        in_specs=[pl.BlockSpec((1, T, E), lambda b: (b, 0, 0)),
                  pl.BlockSpec(lnw.shape, lambda b: (0, 0)),
                  pl.BlockSpec(lnb.shape, lambda b: (0, 0))],
        out_specs=pl.BlockSpec((1, T, E), lambda b: (b, 0, 0)),
        compiler_params=pltpu.CompilerParams(
            dimension_semantics=("parallel",)),
    )(x, lnw, lnb)


# --------------------------------------------------------------------------
# language-model head: streaming (T,E) @ (E, tv) matmul, tiled over vocab
# --------------------------------------------------------------------------
def lm_head_kernel(h_ref, wlm_ref, blm_ref, out_ref):
    out_ref[0] = (jnp.dot(h_ref[0], wlm_ref[...],
                          preferred_element_type=jnp.float32)
                  + blm_ref[...])


def _vocab_tile(V, target=2048):
    """Largest multiple of 128 that divides V (capped at `target`); V itself
    if V is not 128-aligned (toy configs)."""
    if V % 128 != 0:
        return V
    t = min(target, V)
    t -= t % 128
    while V % t != 0:
        t -= 128
    return t


def run_lm_head(h, params):
    B, T, E = h.shape
    wlm, blm = params["w_lm"], params["b_lm"]
    V = wlm.shape[1]
    tv = _vocab_tile(V)
    nv = V // tv

    in_specs = [
        pl.BlockSpec((1, T, E), lambda b, vi: (b, 0, 0)),
        pl.BlockSpec((E, tv), lambda b, vi: (0, vi)),
        pl.BlockSpec((1, tv), lambda b, vi: (0, vi)),
    ]
    per_step = E * tv * 2 + tv * 4 + T * E * 2 + T * tv * 4
    vmem_limit = int(min(max(3 * per_step + (4 << 20), 32 << 20), 100 << 20))

    return pl.pallas_call(
        lm_head_kernel,
        out_shape=jax.ShapeDtypeStruct((B, T, V), jnp.float32),
        grid=(B, nv),
        in_specs=in_specs,
        out_specs=pl.BlockSpec((1, T, tv), lambda b, vi: (b, 0, vi)),
        compiler_params=pltpu.CompilerParams(
            dimension_semantics=("parallel", "parallel"),
            vmem_limit_bytes=vmem_limit),
    )(h, wlm, blm)


def gpt_forward(token_ids, params, n_heads, heads_dim):
    # embedding lookup + positional embedding: plain-JAX glue (HBM gather)
    T = token_ids.shape[-1]
    e = params["tok_emb"][token_ids] + params["pos_emb"][jnp.arange(T)]
    e = e.astype(jnp.float32)
    e = run_blocks(e, params["stacked_layers"], n_heads, heads_dim)
    h = run_final_ln(e, params["ln_f_w"], params["ln_f_b"])
    return run_lm_head(h, params)


def init_params(key, vocab, E, T, H, Dh, n_layers):
    keys = iter(jax.random.split(key, 16))

    def nrm(shape, dtype=jnp.bfloat16, scale=0.02):
        return (scale * jax.random.normal(next(keys), shape)).astype(dtype)

    L, HD = n_layers, H * Dh
    params = {
        "tok_emb": nrm((vocab, E), jnp.float32),
        "pos_emb": nrm((T, E), jnp.float32),
        "ln_f_w": jnp.ones((1, E), jnp.float32),
        "ln_f_b": jnp.zeros((1, E), jnp.float32),
        "w_lm": nrm((E, vocab)),                        # bf16
        "b_lm": jnp.zeros((1, vocab), jnp.float32),
        # per-layer weights stacked along a leading L axis
        "stacked_layers": {
            "ln1_w": jnp.ones((L, 1, E), jnp.float32),
            "ln1_b": jnp.zeros((L, 1, E), jnp.float32),
            "wqkv": nrm((L, E, 3 * HD)),                # fused Q|K|V, bf16
            "wo": nrm((L, HD, E)),                      # bf16
            "bo": jnp.zeros((L, 1, E), jnp.float32),
            "ln2_w": jnp.ones((L, 1, E), jnp.float32),
            "ln2_b": jnp.zeros((L, 1, E), jnp.float32),
            "w1": nrm((L, E, 4 * E)),                   # bf16
            "b1": jnp.zeros((L, 1, 4 * E), jnp.float32),
            "w2": nrm((L, 4 * E, E)),                   # bf16
            "b2": jnp.zeros((L, 1, E), jnp.float32),
        },
    }
    return params


if __name__ == "__main__":
    vocab_size = 64
    embedding_dim = 32
    sequence_length = 8
    n_heads = 4
    heads_dim = 8
    n_layers = 2
    batch = 2

    key = jax.random.PRNGKey(0)
    pkey, xkey = jax.random.split(key)
    params = init_params(pkey, vocab_size, embedding_dim, sequence_length,
                         n_heads, heads_dim, n_layers)
    tokens = jax.random.randint(xkey, (batch, sequence_length), 0, vocab_size,
                                dtype=jnp.int32)

    logits = gpt_forward(tokens, params, n_heads, heads_dim)
    logits = jax.block_until_ready(logits)
    assert logits.shape == (batch, sequence_length, vocab_size)
    assert bool(jnp.all(jnp.isfinite(logits)))
    print("KERNEL_OK")
</pallas_src>

<mosaic_0001>
module attributes {stable_mosaic.version = 11 : i64} {
  func.func @block_kernel(%arg0: i32, %arg1: i32, %arg2: memref<1x8x32xf32, #tpu.memory_space<vmem>>, %arg3: memref<1x1x32xf32, #tpu.memory_space<vmem>>, %arg4: memref<1x1x32xf32, #tpu.memory_space<vmem>>, %arg5: memref<1x32x96xbf16, #tpu.memory_space<vmem>>, %arg6: memref<1x32x32xbf16, #tpu.memory_space<vmem>>, %arg7: memref<1x1x32xf32, #tpu.memory_space<vmem>>, %arg8: memref<1x1x32xf32, #tpu.memory_space<vmem>>, %arg9: memref<1x1x32xf32, #tpu.memory_space<vmem>>, %arg10: memref<1x32x128xbf16, #tpu.memory_space<vmem>>, %arg11: memref<1x1x128xf32, #tpu.memory_space<vmem>>, %arg12: memref<1x128x32xbf16, #tpu.memory_space<vmem>>, %arg13: memref<1x1x32xf32, #tpu.memory_space<vmem>>, %arg14: memref<1x8x32xf32, #tpu.memory_space<vmem>>) attributes {dimension_semantics = [#tpu.dimension_semantics<parallel>, #tpu.dimension_semantics<arbitrary>], iteration_bounds = array<i64: 2, 2>, scalar_prefetch = 0 : i64, scratch_operands = 0 : i64, tpu.core_type = #tpu.core_type<tc>, window_params = [{transform_indices = @transform_0, window_bounds = array<i64: 1, 8, 32>}, {transform_indices = @transform_1, window_bounds = array<i64: 1, 1, 32>}, {transform_indices = @transform_2, window_bounds = array<i64: 1, 1, 32>}, {transform_indices = @transform_3, window_bounds = array<i64: 1, 32, 96>}, {transform_indices = @transform_4, window_bounds = array<i64: 1, 32, 32>}, {transform_indices = @transform_5, window_bounds = array<i64: 1, 1, 32>}, {transform_indices = @transform_6, window_bounds = array<i64: 1, 1, 32>}, {transform_indices = @transform_7, window_bounds = array<i64: 1, 1, 32>}, {transform_indices = @transform_8, window_bounds = array<i64: 1, 32, 128>}, {transform_indices = @transform_9, window_bounds = array<i64: 1, 1, 128>}, {transform_indices = @transform_10, window_bounds = array<i64: 1, 128, 32>}, {transform_indices = @transform_11, window_bounds = array<i64: 1, 1, 32>}, {transform_indices = @transform_12, window_bounds = array<i64: 1, 8, 32>}]} {
    %c0_i32 = arith.constant 0 : i32
    %0 = arith.cmpi eq, %arg1, %c0_i32 : i32
    %1 = arith.extui %0 : i1 to i32
    %c0_i32_0 = arith.constant 0 : i32
    %2 = arith.cmpi ne, %1, %c0_i32_0 : i32
    scf.if %2 {
      %c0_59 = arith.constant 0 : index
      %c0_60 = arith.constant 0 : index
      %c0_61 = arith.constant 0 : index
      %122 = vector.load %arg2[%c0_59, %c0_60, %c0_61] : memref<1x8x32xf32, #tpu.memory_space<vmem>>, vector<1x8x32xf32>
      %123 = vector.shape_cast %122 : vector<1x8x32xf32> to vector<8x32xf32>
      %c0_62 = arith.constant 0 : index
      %c0_63 = arith.constant 0 : index
      %c0_64 = arith.constant 0 : index
      %124 = vector.load %arg14[%c0_62, %c0_63, %c0_64] : memref<1x8x32xf32, #tpu.memory_space<vmem>>, vector<1x8x32xf32>
      %125 = vector.shape_cast %124 : vector<1x8x32xf32> to vector<8x32xf32>
      %126 = vector.shape_cast %123 : vector<8x32xf32> to vector<1x8x32xf32>
      tpu.vector_store %arg14[%c0_62, %c0_63, %c0_64], %126 {strides = array<i32>} : memref<1x8x32xf32, #tpu.memory_space<vmem>>, vector<1x8x32xf32>,
    } else {
    }
    %c0 = arith.constant 0 : index
    %c0_1 = arith.constant 0 : index
    %c0_2 = arith.constant 0 : index
    %3 = vector.load %arg14[%c0, %c0_1, %c0_2] : memref<1x8x32xf32, #tpu.memory_space<vmem>>, vector<1x8x32xf32>
    %4 = vector.shape_cast %3 : vector<1x8x32xf32> to vector<8x32xf32>
    %c0_3 = arith.constant 0 : index
    %c0_4 = arith.constant 0 : index
    %c0_5 = arith.constant 0 : index
    %5 = vector.load %arg3[%c0_3, %c0_4, %c0_5] : memref<1x1x32xf32, #tpu.memory_space<vmem>>, vector<1x1x32xf32>
    %6 = vector.shape_cast %5 : vector<1x1x32xf32> to vector<1x32xf32>
    %c0_6 = arith.constant 0 : index
    %c0_7 = arith.constant 0 : index
    %c0_8 = arith.constant 0 : index
    %7 = vector.load %arg4[%c0_6, %c0_7, %c0_8] : memref<1x1x32xf32, #tpu.memory_space<vmem>>, vector<1x1x32xf32>
    %8 = vector.shape_cast %7 : vector<1x1x32xf32> to vector<1x32xf32>
    %cst = arith.constant dense<0.000000e+00> : vector<8xf32>
    %9 = vector.multi_reduction <add>, %4, %cst [1] : vector<8x32xf32> to vector<8xf32>
    %10 = vector.shape_cast %9 : vector<8xf32> to vector<8x1xf32>
    %cst_9 = arith.constant 3.200000e+01 : f32
    %11 = vector.broadcast %cst_9 : f32 to vector<8x1xf32>
    %12 = arith.divf %10, %11 : vector<8x1xf32>
    %13 = vector.broadcast %12 : vector<8x1xf32> to vector<8x32xf32>
    %14 = arith.subf %4, %13 : vector<8x32xf32>
    %15 = arith.mulf %14, %14 : vector<8x32xf32>
    %cst_10 = arith.constant dense<0.000000e+00> : vector<8xf32>
    %16 = vector.multi_reduction <add>, %15, %cst_10 [1] : vector<8x32xf32> to vector<8xf32>
    %17 = vector.shape_cast %16 : vector<8xf32> to vector<8x1xf32>
    %cst_11 = arith.constant 3.200000e+01 : f32
    %18 = vector.broadcast %cst_11 : f32 to vector<8x1xf32>
    %19 = arith.divf %17, %18 : vector<8x1xf32>
    %cst_12 = arith.constant 9.99999974E-6 : f32
    %20 = vector.broadcast %cst_12 : f32 to vector<8x1xf32>
    %21 = arith.addf %19, %20 : vector<8x1xf32>
    %22 = math.rsqrt %21 : vector<8x1xf32>
    %23 = vector.broadcast %22 : vector<8x1xf32> to vector<8x32xf32>
    %24 = arith.mulf %14, %23 : vector<8x32xf32>
    %25 = vector.broadcast %6 : vector<1x32xf32> to vector<8x32xf32>
    %26 = arith.mulf %24, %25 : vector<8x32xf32>
    %27 = vector.broadcast %8 : vector<1x32xf32> to vector<8x32xf32>
    %28 = arith.addf %26, %27 : vector<8x32xf32>
    %29 = arith.truncf %28 : vector<8x32xf32> to vector<8x32xbf16>
    %c0_13 = arith.constant 0 : index
    %c0_14 = arith.constant 0 : index
    %c0_15 = arith.constant 0 : index
    %30 = vector.load %arg5[%c0_13, %c0_14, %c0_15] : memref<1x32x96xbf16, #tpu.memory_space<vmem>>, vector<1x32x96xbf16>
    %31 = vector.shape_cast %30 : vector<1x32x96xbf16> to vector<32x96xbf16>
    %cst_16 = arith.constant dense<0.000000e+00> : vector<8x96xf32>
    %32 = tpu.matmul %29, %31, %cst_16 {dimension_numbers = #tpu.dot_dimension_numbers<[1], [0], [0], [1], [0, 0, 1, 1], [], []>} : vector<8x32xbf16>, vector<32x96xbf16>, vector<8x96xf32> -> vector<8x96xf32>
    %33 = vector.extract_strided_slice %32 {offsets = [0, 0], sizes = [8, 32], strides = [1, 1]} : vector<8x96xf32> to vector<8x32xf32>
    %cst_17 = arith.constant 0.353553385 : f32
    %34 = vector.broadcast %cst_17 : f32 to vector<8x32xf32>
    %35 = arith.mulf %33, %34 : vector<8x32xf32>
    %36 = vector.shape_cast %35 : vector<8x32xf32> to vector<8x4x8xf32>
    %37 = arith.truncf %36 : vector<8x4x8xf32> to vector<8x4x8xbf16>
    %38 = vector.extract_strided_slice %32 {offsets = [0, 32], sizes = [8, 32], strides = [1, 1]} : vector<8x96xf32> to vector<8x32xf32>
    %39 = vector.shape_cast %38 : vector<8x32xf32> to vector<8x4x8xf32>
    %40 = arith.truncf %39 : vector<8x4x8xf32> to vector<8x4x8xbf16>
    %41 = vector.extract_strided_slice %32 {offsets = [0, 64], sizes = [8, 32], strides = [1, 1]} : vector<8x96xf32> to vector<8x32xf32>
    %42 = vector.shape_cast %41 : vector<8x32xf32> to vector<8x4x8xf32>
    %43 = arith.truncf %42 : vector<8x4x8xf32> to vector<8x4x8xbf16>
    "tpu.trace_start"() <{level = 10 : i32, message = "thd,shd->hts"}> : () -> ()
    %cst_18 = arith.constant dense<0.000000e+00> : vector<4x8x8xf32>
    %44 = tpu.matmul %37, %40, %cst_18 {dimension_numbers = #tpu.dot_dimension_numbers<[2], [2], [0], [0], [0, 1, 0, 0, 1, 0], [1], [1]>} : vector<8x4x8xbf16>, vector<8x4x8xbf16>, vector<4x8x8xf32> -> vector<4x8x8xf32>
    "tpu.trace_stop"() : () -> ()
    %45 = tpu.iota {dimensions = array<i32: 0>} : vector<8x8xi32>
    %46 = tpu.iota {dimensions = array<i32: 1>} : vector<8x8xi32>
    %47 = arith.cmpi sle, %46, %45 : vector<8x8xi32>
    %48 = vector.shape_cast %47 : vector<8x8xi1> to vector<1x8x8xi1>
    %cst_19 = arith.constant -1.000000e+30 : f32
    %49 = vector.shape_cast %48 : vector<1x8x8xi1> to vector<1x8x8xi1>
    %50 = vector.broadcast %49 : vector<1x8x8xi1> to vector<4x8x8xi1>
    %51 = vector.broadcast %cst_19 : f32 to vector<4x8x8xf32>
    %52 = arith.select %50, %44, %51 : vector<4x8x8xi1>, vector<4x8x8xf32>
    %cst_20 = arith.constant dense<0xFF800000> : vector<4x8xf32>
    %53 = vector.multi_reduction <maximumf>, %52, %cst_20 [2] : vector<4x8x8xf32> to vector<4x8xf32>
    %54 = vector.shape_cast %53 : vector<4x8xf32> to vector<4x8x1xf32>
    %55 = vector.broadcast %54 : vector<4x8x1xf32> to vector<4x8x8xf32>
    %56 = arith.subf %52, %55 : vector<4x8x8xf32>
    %57 = math.exp %56 : vector<4x8x8xf32>
    %cst_21 = arith.constant dense<0.000000e+00> : vector<4x8xf32>
    %58 = vector.multi_reduction <add>, %57, %cst_21 [2] : vector<4x8x8xf32> to vector<4x8xf32>
    %59 = vector.shape_cast %58 : vector<4x8xf32> to vector<4x8x1xf32>
    %60 = tpu.reciprocal %59 {approx = true} : vector<4x8x1xf32> -> vector<4x8x1xf32>
    %61 = vector.broadcast %60 : vector<4x8x1xf32> to vector<4x8x8xf32>
    %62 = arith.mulf %57, %61 : vector<4x8x8xf32>
    %63 = arith.truncf %62 : vector<4x8x8xf32> to vector<4x8x8xbf16>
    "tpu.trace_start"() <{level = 10 : i32, message = "hts,shd->thd"}> : () -> ()
    %cst_22 = arith.constant dense<0.000000e+00> : vector<4x8x8xf32>
    %64 = tpu.matmul %43, %63, %cst_22 {dimension_numbers = #tpu.dot_dimension_numbers<[0], [2], [2], [1], [0, 1, 0, 2, 1, 1], [1], [0]>} : vector<8x4x8xbf16>, vector<4x8x8xbf16>, vector<4x8x8xf32> -> vector<4x8x8xf32>
    %65 = tpu.transpose %64, [2, 0, 1] : vector<4x8x8xf32> -> vector<8x4x8xf32>
    "tpu.trace_stop"() : () -> ()
    %66 = vector.shape_cast %65 : vector<8x4x8xf32> to vector<8x32xf32>
    %67 = arith.truncf %66 : vector<8x32xf32> to vector<8x32xbf16>
    %c0_23 = arith.constant 0 : index
    %c0_24 = arith.constant 0 : index
    %c0_25 = arith.constant 0 : index
    %68 = vector.load %arg6[%c0_23, %c0_24, %c0_25] : memref<1x32x32xbf16, #tpu.memory_space<vmem>>, vector<1x32x32xbf16>
    %69 = vector.shape_cast %68 : vector<1x32x32xbf16> to vector<32x32xbf16>
    %cst_26 = arith.constant dense<0.000000e+00> : vector<8x32xf32>
    %70 = tpu.matmul %67, %69, %cst_26 {dimension_numbers = #tpu.dot_dimension_numbers<[1], [0], [0], [1], [0, 0, 1, 1], [], []>} : vector<8x32xbf16>, vector<32x32xbf16>, vector<8x32xf32> -> vector<8x32xf32>
    %71 = arith.addf %4, %70 : vector<8x32xf32>
    %c0_27 = arith.constant 0 : index
    %c0_28 = arith.constant 0 : index
    %c0_29 = arith.constant 0 : index
    %72 = vector.load %arg7[%c0_27, %c0_28, %c0_29] : memref<1x1x32xf32, #tpu.memory_space<vmem>>, vector<1x1x32xf32>
    %73 = vector.shape_cast %72 : vector<1x1x32xf32> to vector<1x32xf32>
    %74 = vector.broadcast %73 : vector<1x32xf32> to vector<8x32xf32>
    %75 = arith.addf %71, %74 : vector<8x32xf32>
    %c0_30 = arith.constant 0 : index
    %c0_31 = arith.constant 0 : index
    %c0_32 = arith.constant 0 : index
    %76 = vector.load %arg8[%c0_30, %c0_31, %c0_32] : memref<1x1x32xf32, #tpu.memory_space<vmem>>, vector<1x1x32xf32>
    %77 = vector.shape_cast %76 : vector<1x1x32xf32> to vector<1x32xf32>
    %c0_33 = arith.constant 0 : index
    %c0_34 = arith.constant 0 : index
    %c0_35 = arith.constant 0 : index
    %78 = vector.load %arg9[%c0_33, %c0_34, %c0_35] : memref<1x1x32xf32, #tpu.memory_space<vmem>>, vector<1x1x32xf32>
    %79 = vector.shape_cast %78 : vector<1x1x32xf32> to vector<1x32xf32>
    %cst_36 = arith.constant dense<0.000000e+00> : vector<8xf32>
    %80 = vector.multi_reduction <add>, %75, %cst_36 [1] : vector<8x32xf32> to vector<8xf32>
    %81 = vector.shape_cast %80 : vector<8xf32> to vector<8x1xf32>
    %cst_37 = arith.constant 3.200000e+01 : f32
    %82 = vector.broadcast %cst_37 : f32 to vector<8x1xf32>
    %83 = arith.divf %81, %82 : vector<8x1xf32>
    %84 = vector.broadcast %83 : vector<8x1xf32> to vector<8x32xf32>
    %85 = arith.subf %75, %84 : vector<8x32xf32>
    %86 = arith.mulf %85, %85 : vector<8x32xf32>
    %cst_38 = arith.constant dense<0.000000e+00> : vector<8xf32>
    %87 = vector.multi_reduction <add>, %86, %cst_38 [1] : vector<8x32xf32> to vector<8xf32>
    %88 = vector.shape_cast %87 : vector<8xf32> to vector<8x1xf32>
    %cst_39 = arith.constant 3.200000e+01 : f32
    %89 = vector.broadcast %cst_39 : f32 to vector<8x1xf32>
    %90 = arith.divf %88, %89 : vector<8x1xf32>
    %cst_40 = arith.constant 9.99999974E-6 : f32
    %91 = vector.broadcast %cst_40 : f32 to vector<8x1xf32>
    %92 = arith.addf %90, %91 : vector<8x1xf32>
    %93 = math.rsqrt %92 : vector<8x1xf32>
    %94 = vector.broadcast %93 : vector<8x1xf32> to vector<8x32xf32>
    %95 = arith.mulf %85, %94 : vector<8x32xf32>
    %96 = vector.broadcast %77 : vector<1x32xf32> to vector<8x32xf32>
    %97 = arith.mulf %95, %96 : vector<8x32xf32>
    %98 = vector.broadcast %79 : vector<1x32xf32> to vector<8x32xf32>
    %99 = arith.addf %97, %98 : vector<8x32xf32>
    %100 = arith.truncf %99 : vector<8x32xf32> to vector<8x32xbf16>
    %c0_41 = arith.constant 0 : index
    %c0_42 = arith.constant 0 : index
    %c0_43 = arith.constant 0 : index
    %101 = vector.load %arg10[%c0_41, %c0_42, %c0_43] : memref<1x32x128xbf16, #tpu.memory_space<vmem>>, vector<1x32x128xbf16>
    %102 = vector.shape_cast %101 : vector<1x32x128xbf16> to vector<32x128xbf16>
    %cst_44 = arith.constant dense<0.000000e+00> : vector<8x128xf32>
    %103 = tpu.matmul %100, %102, %cst_44 {dimension_numbers = #tpu.dot_dimension_numbers<[1], [0], [0], [1], [0, 0, 1, 1], [], []>} : vector<8x32xbf16>, vector<32x128xbf16>, vector<8x128xf32> -> vector<8x128xf32>
    %c0_45 = arith.constant 0 : index
    %c0_46 = arith.constant 0 : index
    %c0_47 = arith.constant 0 : index
    %104 = vector.load %arg11[%c0_45, %c0_46, %c0_47] : memref<1x1x128xf32, #tpu.memory_space<vmem>>, vector<1x1x128xf32>
    %105 = vector.shape_cast %104 : vector<1x1x128xf32> to vector<1x128xf32>
    %106 = vector.broadcast %105 : vector<1x128xf32> to vector<8x128xf32>
    %107 = arith.addf %103, %106 : vector<8x128xf32>
    %cst_48 = arith.constant 0.000000e+00 : f32
    %108 = vector.broadcast %cst_48 : f32 to vector<8x128xf32>
    %109 = arith.maximumf %107, %108 : vector<8x128xf32>
    %110 = arith.truncf %109 : vector<8x128xf32> to vector<8x128xbf16>
    %c0_49 = arith.constant 0 : index
    %c0_50 = arith.constant 0 : index
    %c0_51 = arith.constant 0 : index
    %111 = vector.load %arg12[%c0_49, %c0_50, %c0_51] : memref<1x128x32xbf16, #tpu.memory_space<vmem>>, vector<1x128x32xbf16>
    %112 = vector.shape_cast %111 : vector<1x128x32xbf16> to vector<128x32xbf16>
    %cst_52 = arith.constant dense<0.000000e+00> : vector<8x32xf32>
    %113 = tpu.matmul %110, %112, %cst_52 {dimension_numbers = #tpu.dot_dimension_numbers<[1], [0], [0], [1], [0, 0, 1, 1], [], []>} : vector<8x128xbf16>, vector<128x32xbf16>, vector<8x32xf32> -> vector<8x32xf32>
    %c0_53 = arith.constant 0 : index
    %c0_54 = arith.constant 0 : index
    %c0_55 = arith.constant 0 : index
    %114 = vector.load %arg13[%c0_53, %c0_54, %c0_55] : memref<1x1x32xf32, #tpu.memory_space<vmem>>, vector<1x1x32xf32>
    %115 = vector.shape_cast %114 : vector<1x1x32xf32> to vector<1x32xf32>
    %116 = vector.broadcast %115 : vector<1x32xf32> to vector<8x32xf32>
    %117 = arith.addf %113, %116 : vector<8x32xf32>
    %118 = arith.addf %75, %117 : vector<8x32xf32>
    %c0_56 = arith.constant 0 : index
    %c0_57 = arith.constant 0 : index
    %c0_58 = arith.constant 0 : index
    %119 = vector.load %arg14[%c0_56, %c0_57, %c0_58] : memref<1x8x32xf32, #tpu.memory_space<vmem>>, vector<1x8x32xf32>
    %120 = vector.shape_cast %119 : vector<1x8x32xf32> to vector<8x32xf32>
    %121 = vector.shape_cast %118 : vector<8x32xf32> to vector<1x8x32xf32>
    tpu.vector_store %arg14[%c0_56, %c0_57, %c0_58], %121 {strides = array<i32>} : memref<1x8x32xf32, #tpu.memory_space<vmem>>, vector<1x8x32xf32>,
    return
  }
  func.func @transform_0(%arg0: i32, %arg1: i32) -> (i32, i32, i32) {
    %c0_i32 = arith.constant 0 : i32
    %c0_i32_0 = arith.constant 0 : i32
    %c0_i32_1 = arith.constant 0 : i32
    return %arg0, %c0_i32, %c0_i32_0 : i32, i32, i32
  }
  func.func @transform_1(%arg0: i32, %arg1: i32) -> (i32, i32, i32) {
    %c0_i32 = arith.constant 0 : i32
    %c0_i32_0 = arith.constant 0 : i32
    %c0_i32_1 = arith.constant 0 : i32
    return %arg1, %c0_i32, %c0_i32_0 : i32, i32, i32
  }
  func.func @transform_2(%arg0: i32, %arg1: i32) -> (i32, i32, i32) {
    %c0_i32 = arith.constant 0 : i32
    %c0_i32_0 = arith.constant 0 : i32
    %c0_i32_1 = arith.constant 0 : i32
    return %arg1, %c0_i32, %c0_i32_0 : i32, i32, i32
  }
  func.func @transform_3(%arg0: i32, %arg1: i32) -> (i32, i32, i32) {
    %c0_i32 = arith.constant 0 : i32
    %c0_i32_0 = arith.constant 0 : i32
    %c0_i32_1 = arith.constant 0 : i32
    return %arg1, %c0_i32, %c0_i32_0 : i32, i32, i32
  }
  func.func @transform_4(%arg0: i32, %arg1: i32) -> (i32, i32, i32) {
    %c0_i32 = arith.constant 0 : i32
    %c0_i32_0 = arith.constant 0 : i32
    %c0_i32_1 = arith.constant 0 : i32
    return %arg1, %c0_i32, %c0_i32_0 : i32, i32, i32
  }
  func.func @transform_5(%arg0: i32, %arg1: i32) -> (i32, i32, i32) {
    %c0_i32 = arith.constant 0 : i32
    %c0_i32_0 = arith.constant 0 : i32
    %c0_i32_1 = arith.constant 0 : i32
    return %arg1, %c0_i32, %c0_i32_0 : i32, i32, i32
  }
  func.func @transform_6(%arg0: i32, %arg1: i32) -> (i32, i32, i32) {
    %c0_i32 = arith.constant 0 : i32
    %c0_i32_0 = arith.constant 0 : i32
    %c0_i32_1 = arith.constant 0 : i32
    return %arg1, %c0_i32, %c0_i32_0 : i32, i32, i32
  }
  func.func @transform_7(%arg0: i32, %arg1: i32) -> (i32, i32, i32) {
    %c0_i32 = arith.constant 0 : i32
    %c0_i32_0 = arith.constant 0 : i32
    %c0_i32_1 = arith.constant 0 : i32
    return %arg1, %c0_i32, %c0_i32_0 : i32, i32, i32
  }
  func.func @transform_8(%arg0: i32, %arg1: i32) -> (i32, i32, i32) {
    %c0_i32 = arith.constant 0 : i32
    %c0_i32_0 = arith.constant 0 : i32
    %c0_i32_1 = arith.constant 0 : i32
    return %arg1, %c0_i32, %c0_i32_0 : i32, i32, i32
  }
  func.func @transform_9(%arg0: i32, %arg1: i32) -> (i32, i32, i32) {
    %c0_i32 = arith.constant 0 : i32
    %c0_i32_0 = arith.constant 0 : i32
    %c0_i32_1 = arith.constant 0 : i32
    return %arg1, %c0_i32, %c0_i32_0 : i32, i32, i32
  }
  func.func @transform_10(%arg0: i32, %arg1: i32) -> (i32, i32, i32) {
    %c0_i32 = arith.constant 0 : i32
    %c0_i32_0 = arith.constant 0 : i32
    %c0_i32_1 = arith.constant 0 : i32
    return %arg1, %c0_i32, %c0_i32_0 : i32, i32, i32
  }
  func.func @transform_11(%arg0: i32, %arg1: i32) -> (i32, i32, i32) {
    %c0_i32 = arith.constant 0 : i32
    %c0_i32_0 = arith.constant 0 : i32
    %c0_i32_1 = arith.constant 0 : i32
    return %arg1, %c0_i32, %c0_i32_0 : i32, i32, i32
  }
  func.func @transform_12(%arg0: i32, %arg1: i32) -> (i32, i32, i32) {
    %c0_i32 = arith.constant 0 : i32
    %c0_i32_0 = arith.constant 0 : i32
    %c0_i32_1 = arith.constant 0 : i32
    return %arg0, %c0_i32, %c0_i32_0 : i32, i32, i32
  }
}

</mosaic_0001>

<bundles_post_ra>
// kernel: tpu_custom_call.1
= control target key start
LH: loop header
LB: loop body
LE: loop exit
PB: predicated region body
PF: predicated region fallthrough
CT: control target
= control target key end

     0   :  { %s4033_s0 = inlined_call_operand.vmem [shape: f32[2,8,32], index: 0, kind: input, shape index: {}]   ;;  %s4034_s1 = inlined_call_operand.vmem [shape: f32[2,1,32], index: 1, kind: input, shape index: {}]   ;;  %s4035_s2 = inlined_call_operand.vmem [shape: f32[2,1,32], index: 2, kind: input, shape index: {}]   ;;  %s4036_s3 = inlined_call_operand.vmem [shape: bf16[2,32,96], index: 3, kind: input, shape index: {}]   ;;  %s4037_s4 = inlined_call_operand.vmem [shape: bf16[2,32,32], index: 4, kind: input, shape index: {}]   ;;  %s4038_s5 = inlined_call_operand.vmem [shape: f32[2,1,32], index: 5, kind: input, shape index: {}]   ;;  %s4039_s6 = inlined_call_operand.vmem [shape: f32[2,1,32], index: 6, kind: input, shape index: {}]   ;;  %s4040_s7 = inlined_call_operand.vmem [shape: f32[2,1,32], index: 7, kind: input, shape index: {}]   ;;  %s4041_s8 = inlined_call_operand.vmem [shape: bf16[2,32,128], index: 8, kind: input, shape index: {}]   ;;  %s4042_s9 = inlined_call_operand.vmem [shape: f32[2,1,128], index: 9, kind: input, shape index: {}]   ;;  %s4043_s10 = inlined_call_operand.vmem [shape: bf16[2,128,32], index: 10, kind: input, shape index: {}]   ;;  %s4044_s11 = inlined_call_operand.vmem [shape: f32[2,1,32], index: 11, kind: input, shape index: {}]   ;;  %s4045_s12 = inlined_call_operand.hbm [shape: f32[2,8,32], index: 12, kind: output, shape index: {}]  }
   0x1   :  { %4061 = sst [smem:[#allocation18_spill]] %s4033_s0 }
   0x2   :  { %4062 = sst [smem:[#allocation19_spill]] %s4036_s3 }
   0x3   :  { %4063 = sst [smem:[#allocation20_spill]] %s4037_s4 }
   0x4   :  { %4064 = sst [smem:[#allocation21_spill]] %s4045_s12 }
   0x5   :  { %17 = vsyncpa [#allocation3], 0 }
   0x6   :  { %19 = vsyncpa [#allocation3 + $0x1], 0  ;;  %s3534_s21 = smov 0   ;;  %s3536_s22 = smov 0  }
   0x7   :  { %s3538_s23 = smov 0   ;;  %s3540_s24 = smov 0  }
   0x8   :  { %s3542_s25 = smov 0   ;;  %s3544_s26 = smov 0  }
   0x9   :  { %s3546_s27 = smov 0   ;;  %s3548_s28 = smov 0  }
   0xa LB: > { %4065 = sst [smem:[#allocation5_spill]] %s3425_s21  ;;  %s3052_s29 = sadd.s32 4294967295, %s3453_s28   ;;  %s3453_s28 = sphi %s3548_s28, %s25_s28   ;;  %s3449_s27 = sphi %s3546_s27, %s4102_s27   ;;  %s3445_s26 = sphi %s3544_s26, %s4101_s26   ;;  %s3441_s25 = sphi %s3542_s25, %s4100_s25   ;;  %s3437_s24 = sphi %s3540_s24, %s4099_s24   ;;  %s3433_s23 = sphi %s3538_s23, %s4098_s23   ;;  %s3429_s22 = sphi %s3536_s22, %s4097_s22   ;;  %s3425_s21 = sphi %s3534_s21, %s4096_s21  }
   0xb   : > { %4066 = sst [smem:[#allocation6_spill]] %s3429_s22  ;;  %s3053_s30 = sadd.s32 4294967294, %s3453_s28  }
   0xc   : > { %4067 = sst [smem:[#allocation7_spill]] %s3433_s23  ;;  %s34_s13 = sadd.s32 1, %s3445_s26 }
   0xd   : > { %4068 = sst [smem:[#allocation8_spill]] %s3437_s24  ;;  %p35_p0 = scmp.ge.s32.totalorder %s34_s13, 2 }
   0xe   : > { %4069 = sst [smem:[#allocation9_spill]] %s3441_s25  ;;  %s37_s14 = sadd.s32 1, %s3449_s27 }
   0xf   : > { %4070 = sst [smem:[#allocation10_spill]] %s3445_s26  ;;  %p366_p1 = scmp.ne.s32.totalorder %s3433_s23, %s3429_s22 }
  0x10   : > { %4071 = sst [smem:[#allocation11_spill]] %s3449_s27  ;;  %p367_p2 = scmp.eq.s32.totalorder %s3052_s29, 3 }
  0x11   : > { %4072 = sst [smem:[#allocation12_spill]] %s3453_s28  ;;  %s4104_s13 = smov (%p35_p0, %s34_s13), 0 }
  0x12   : > { %4073 = sst [smem:[#allocation13_spill]] %s4104_s13  ;;  %s4106_s14 = smov (!%p35_p0, %s37_s14), %s3449_s27 }
  0x13   : > { %p3583_p3 = por %p367_p2, %p366_p1  ;;  %p372_p4 = scmp.ne.s32.totalorder %s3429_s22, %s3425_s21 }
  0x14   : > { %p39_p5 = scmp.ge.s32.totalorder %s4106_s14, 2  ;;  %p373_p6 = scmp.eq.s32.totalorder %s3053_s30, 3 }
  0x15   : > { %s4074_s15 = scalar_select %p3583_p3, 1, 0 }
  0x16   : > { %p3056_p7 = scmp.ge.s32.totalorder %s3453_s28, 1  ;;  %p472_p8 = scmp.lt.s32.totalorder %s3453_s28, 5 }
  0x17   : > { %4075 = sst [smem:[#allocation14_spill]] %s4074_s15  ;;  %s4108_s14 = smov (%p39_p5, %s4106_s14), 0 }
  0x18   : > { %4076 = sst [smem:[#allocation15_spill]] %s4108_s14  ;;  %p3593_p9 = por %p373_p6, %p372_p4 }
  0x19   : > { %p473_p10 = pnand %p3056_p7, %p472_p8  ;;  %s353_s17 = ssub.s32 %s3449_s27, %s4108_s14 }
  0x1a   : > { %s4077_s16 = scalar_select %p3593_p9, 1, 0 }
  0x1b   : > { %s356_s18 = sadd.s32 1, %s3433_s23  ;;  %p354_p11 = scmp.eq.s32.totalorder %s353_s17, 0 }
  0x1c   : > { %4078 = sst [smem:[#allocation16_spill]] %s4077_s16  ;;  %476 = sbr.rel (%p473_p10) target bundleno = 3188 (0xc74), region = 68 }
  0x1d   : > { %s3601_s19 = scalar_select %p354_p11, %s3433_s23, %s356_s18  }
  0x1e   : > { %s4049_s20 = sand.u32 (!%p473_p10), 1, %s3429_s22   ;;  %p554_p12 = scmp.lt.s32.totalorder (!%p473_p10), %s3441_s25, 1 }
  0x1f   : > { %4079 = sst [smem:[#allocation17_spill]] %s3601_s19  ;;  %s3057_s29 = sshll.u32 (!%p473_p10), %s4049_s20, 3 }
  0x20   : > { %p558_p13 = scmp.lt.s32.totalorder (!%p473_p10), %s3437_s24, 1  ;;  %s4080_s0 = sld [smem:[#allocation18_spill]] (!%p473_p10) }
  0x21   : > { %s4081_s3 = sld [smem:[#allocation19_spill]] (!%p473_p10)  ;;  %s4082_s4 = sld [smem:[#allocation20_spill]] (!%p473_p10) }
  0x22   : > { %s3665_s16 = scalar_lea.vmem (!%p473_p10), [#allocation2], %s3057_s29  ;;  %s4083_s19 = sld [smem:[#allocation8_spill]] (!%p473_p10) }
  0x23   : > { %s555_s30 = scalar_select %p554_p12, %s3441_s25, 1 }
  0x24   : > { %s3610_s13 = scalar_select %p558_p13, %s3437_s24, 1 }
  0x25   : > { %s3058_s17 = sshll.u32 %s555_s30, 3 }
  0x26   : > { %s557_s27 = scalar_lea.vmem %s4080_s0, %s3058_s17  ;;  %s3110_s28 = sshll.u32 %s3610_s13, 4 }
  0x27   : > { %s3627_s22 = scalar_lea.vmem %s4081_s3, %s3110_s28  ;;  %s3632_s24 = scalar_lea.vmem %s4082_s4, %s3110_s28 }
  0x28   : > { %s579_s23 = scalar_lea.vmem %s4039_s6, %s3610_s13  ;;  %s3649_s0 = scalar_lea.vmem %s4041_s8, %s3110_s28 }
  0x29   : > { %s590_s3 = scalar_lea.vmem %s4042_s9, %s3610_s13  ;;  %s3113_s4 = sshll.u32 %s3610_s13, 6 }
  0x2a   : > { %s3659_s26 = scalar_lea.vmem %s4043_s10, %s3113_s4  ;;  %s598_s21 = scalar_lea.vmem %s4044_s11, %s3610_s13 }
  0x2b   : > { %p3067_p0 = scmp.ne.s32.totalorder %s4083_s19, 0 }
  0x2c   : > { %v604_v0 = vld [vmem:[%s557_s27] sm:$0xff] (!%p3067_p0)  ;;  %vm605_vm0 = vcmask (!%p3067_p0), 261120  }
  0x2d   : > { %603 = sbr.rel (%p3067_p0) target bundleno = 52 (0x34), region = 72  ;;  %606 = vst.msk [vmem:[%s3665_s16] sm:$0xff] (!%p3067_p0), %vm605_vm0, %v604_v0 }
  0x34 PF: > { %v607_v1 = vld [vmem:[%s3665_s16] sm:$0xff]  ;;  %vm610_vm1 = vcmask 261120   ;;  %v3455_v9 = vmov 0.0   ;;  %vm3456_vm2 = vmmov 0   ;;  %s4084_s28 = scalar_lea.vmem %s4034_s1, %s3610_s13  ;;  %s4085_s29 = scalar_lea.vmem %s4035_s2, %s3610_s13  ;;  %v3461_v29 = vmov 1983009808  }
  0x35   : > { %v611_v2 = vsel %vm610_vm1, %v607_v1, 0.0  ;;  %v3324_v8 = vld [vmem:[%s3627_s22] sm:$0xff]   ;;  %3148 = vmatprep.subr.bf16.mxu1 %v3455_v9  ;;  %3152 = vmatprep.mubr.msk.bf16.mxu1 %vm3456_vm2, %v3455_v9  ;;  %v3325_v10 = vld [vmem:[%s3627_s22 + $0x8] sm:$0xff]   ;;  %s3457_s12 = smov 104   ;;  %s3458_s15 = smov 120   ;;  %v713_v30 = vunpack.c.l.s4 %v3461_v29  ;;  %v715_v31 = vlaneseq  ;;  %vm1453_vm3 = vcmask 1043456  }
  0x36   : > { %612 = vadd.xlane.f32.xlu0 %v611_v2  ;;  %3149 = vmatpush3.bf16.msra.mxu1 %v3324_v8  ;;  %v3068_v15 = vld [vmem:[%s4084_s28] ss:$0 sm:$0xff]  ;;  %s3459_s25 = smov 112   ;;  %s3460_s30 = smov 96   ;;  %v3462_v35 = vmov 1934713408  }
  0x37   : > { %3168 = vmatprep.subr.bf16.mxu0 %v3455_v9  ;;  %3150 = vmatprep.subr.bf16.mxu1 %v3455_v9  ;;  %v3069_v17 = vld [vmem:[%s4085_s29] ss:$0 sm:$0xff]  ;;  %v714_v33 = vunpack.c.0.s8 %v713_v30  ;;  %v3714_v34 = vshrl.u32 %v715_v31, 7  ;;  %v745_v36 = vunpack.c.l.s4 %v3462_v35  ;;  %s3464_s14 = smov 64   ;;  %vm1449_vm4 = vcmask 64512   ;;  %s3466_s17 = smov 8  }
  0x38   : > { %3170 = vmatprep.mubr.msk.bf16.mxu0 %vm3456_vm2, %v3455_v9  ;;  %s3467_s20 = smov 24   ;;  %vm2573_vm6 = vcmask 130048   ;;  %vm2575_vm7 = vcmask 195584   ;;  %s4086_s27 = scalar_lea.vmem %s4038_s5, %s3610_s13 }
  0x39   : > { %v3717_v38 = vsub.s32 %v714_v33, %v3714_v34  ;;  %v746_v40 = vunpack.c.0.s8 %v745_v36  ;;  %s4087_s29 = scalar_lea.vmem %s4040_s7, %s3610_s13  ;;  %s4091_s18 = sld [smem:[#allocation21_spill]] }
  0x3a   : > { %3151 = vmatpush3.bf16.msra.mxu1 %v3325_v10 }
  0x3b   : > { %3156 = vmatprep.subr.bf16.mxu1 %v3455_v9  ;;  %v3723_v48 = vsub.s32 %v746_v40, %v3714_v34 }
  0xc3   : > { %v613_v3 = vpop.xlane.xlu0 %612 }
  0xc4   : > { %v615_v4 = vmul.f32 0.03125, %v613_v3 }
  0xc6   : > { %v616_v5 = vsub.f32 %v607_v1, %v615_v4 }
  0xc8   : > { %v617_v6 = vmul.f32 %v616_v5, %v616_v5 }
  0xca   : > { %v618_v7 = vsel %vm610_vm1, %v617_v6, 0.0 }
  0xcb   : > { %619 = vadd.xlane.f32.xlu0 %v618_v7 }
 0x158   : > { %v620_v11 = vpop.xlane.xlu0 %619 }
 0x159   : > { %v621_v12 = vmul.f32 0.03125, %v620_v11 }
 0x15b   : > { %v622_v13 = vadd.f32 1e-05, %v621_v12 }
 0x15d   : > { %3338 = vrsqrt.f32 %v622_v13 }
 0x167   : > { %v3339_v14 = vpop.eup %3338 }
 0x168   : > { %v624_v16 = vmul.f32 %v3339_v14, %v616_v5 }
 0x16a   : > { %v631_v18 = vmul.f32 %v3068_v15, %v624_v16 }
 0x16c   : > { %v638_v19 = vadd.f32 %v3069_v17, %v631_v18 }
 0x16e   : > { %v639_v20 = vpack.c.bf16 %v638_v19, %v638_v19 }
 0x170   : > { %3153 = vmatmul.mubr.msk.bf16.vlgmr.msra.gmra.mrb[0].mxu1 %vm610_vm1, %v639_v20 }
 0x171   : > { %3158 = vmatprep.mubr.msk.bf16.mxu1 %vm3456_vm2, %v3455_v9 }
 0x243   : > { %v3695_v21 = vpop.f32.mrb[0].mxu1 }
 0x244   : > { %791 = vrot.lane.b32.xlu0 %v3695_v21, %s3457_s12  ;;  %787 = vrot.lane.b32.xlu1 %v3695_v21, %s3458_s15  ;;  %v3154_v22 = vpop.f32.mrb[1].mxu1  ;;  %v3735_v6 = vmul.f32 0.35355338, %v3695_v21 }
 0x245   : > { %v696_v23 = vpop.f32.mrb[2].mxu1 }
 0x246   : > { %v3155_v24 = vpop.f32.mrb[3].mxu1 }
 0x248   : > { %789 = vrot.lane.b32.xlu1 %v3695_v21, %s3459_s25 }
 0x24c   : > { %793 = vrot.lane.b32.xlu1 %v3695_v21, %s3460_s30 }
 0x2b6   : > { %v3704_v25 = vpop.permute.xlu1 %787  ;;  %v3710_v27 = vpop.permute.xlu0 %791 }
 0x2b7   : > { %795 = vrot.lane.b32.xlu1 %v3704_v25, %s3460_s30 }
 0x2ba   : > { %v3707_v26 = vpop.permute.xlu1 %789 }
 0x2bb   : > { %797 = vrot.lane.b32.xlu1 %v3707_v26, %s3460_s30 }
 0x2be   : > { %v794_v28 = vpop.permute.xlu1 %793 }
 0x2bf   : > { %799 = vrot.lane.b32.xlu1 %v3710_v27, %s3460_s30 }
 0x329   : > { %v796_v32 = vpop.permute.xlu1 %795 }
 0x32d   : > { %v798_v37 = vpop.permute.xlu1 %797 }
 0x32e   : > { %v805_v39 = vcombine.low %v794_v28, %v798_v37  ;;  %v806_v42 = vcombine.high %v794_v28, %v798_v37 }
 0x330   : > { %v813_v45 = vrot.slane %v805_v39, %v3717_v38  ;;  %v820_v49 = vrot.slane %v806_v42, %v3717_v38 }
 0x331   : > { %v800_v41 = vpop.permute.xlu1 %799 }
 0x332   : > { %v821_v43 = vcombine.low %v796_v32, %v800_v41  ;;  %v822_v44 = vcombine.high %v796_v32, %v800_v41 }
 0x334   : > { %v829_v46 = vrot.slane %v821_v43, %v3717_v38  ;;  %v836_v47 = vrot.slane %v822_v44, %v3717_v38  ;;  %v3463_v43 = vmov 0  }
 0x336   : > { %v837_v50 = vcombine.low %v813_v45, %v829_v46  ;;  %v838_v51 = vcombine.high %v813_v45, %v829_v46  ;;  %v853_v54 = vcombine.low %v820_v49, %v836_v47  ;;  %v854_v60 = vcombine.high %v820_v49, %v836_v47 }
 0x338   : > { %v845_v52 = vrot.slane %v837_v50, %v3723_v48  ;;  %v852_v53 = vrot.slane %v838_v51, %v3723_v48  ;;  %v861_v59 = vrot.slane %v853_v54, %v3723_v48  ;;  %v868_v0 = vrot.slane %v854_v60, %v3723_v48 }
 0x33a   : > { %v873_v55 = vpack.c.bf16 %v845_v52, %v845_v52  ;;  %v869_v56 = vcombine.high %v845_v52, %v3455_v9  ;;  %v870_v58 = vcombine.high %v852_v53, %v3455_v9  ;;  %v875_v61 = vpack.c.bf16 %v852_v53, %v852_v53 }
 0x33b   : > { %v871_v63 = vcombine.high %v861_v59, %v3455_v9  ;;  %v877_v1 = vpack.c.bf16 %v861_v59, %v861_v59  ;;  %v872_v3 = vcombine.high %v868_v0, %v3455_v9  ;;  %v879_v4 = vpack.c.bf16 %v868_v0, %v868_v0 }
 0x33c   : > { %1031 = vxpose.xlu1.c.b16.start.end [1/1] (short) (narrow) %v873_v55, 16  ;;  %v874_v57 = vpack.c.bf16 %v869_v56, %v869_v56  ;;  %v876_v62 = vpack.c.bf16 %v870_v58, %v870_v58 }
 0x33d   : > { %v878_v2 = vpack.c.bf16 %v871_v63, %v871_v63  ;;  %v880_v5 = vpack.c.bf16 %v872_v3, %v872_v3 }
 0x33e   : > { %1047 = vxpose.xlu0.c.b16.start.end [1/1] (short) (narrow) %v874_v57, 16 }
 0x340   : > { %1063 = vxpose.xlu1.c.b16.start.end [1/1] (short) (narrow) %v875_v61, 16 }
 0x342   : > { %1079 = vxpose.xlu0.c.b16.start.end [1/1] (short) (narrow) %v876_v62, 16 }
 0x344   : > { %1095 = vxpose.xlu1.c.b16.start.end [1/1] (short) (narrow) %v877_v1, 16 }
 0x346   : > { %1111 = vxpose.xlu0.c.b16.start.end [1/1] (short) (narrow) %v878_v2, 16 }
 0x348   : > { %1127 = vxpose.xlu1.c.b16.start.end [1/1] (short) (narrow) %v879_v4, 16 }
 0x34a   : > { %1143 = vxpose.xlu0.c.b16.start.end [1/1] (short) (narrow) %v880_v5, 16 }
 0x34c   : > { %701 = vrot.lane.b32.xlu1 %v3735_v6, %s3458_s15 }
 0x350   : > { %707 = vrot.lane.b32.xlu1 %v3735_v6, %s3457_s12  ;;  %s4088_s12 = sld [smem:[#allocation9_spill]] }
 0x353   : > { %704 = vrot.lane.b32.xlu0 %v3735_v6, %s3459_s25  ;;  %s4089_s25 = sld [smem:[#allocation6_spill]] }
 0x359   : > { %s4092_s13 = sand.u32 1, %s4089_s25  }
 0x3a2   : > { %v1039_v7 = vpop.trf.xlu1 }
 0x3a4   : > { %v1055_v8 = vpop.trf.xlu0 }
 0x3a6   : > { %v1071_v10 = vpop.trf.xlu1 }
 0x3a8   : > { %v1087_v11 = vpop.trf.xlu0 }
 0x3aa   : > { %v1103_v12 = vpop.trf.xlu1 }
 0x3ab   : > { %v1159_v14 = vcombine.low %v1039_v7, %v1103_v12 }
 0x3ac   : > { %v1119_v13 = vpop.trf.xlu0 }
 0x3ad   : > { %v1193_v16 = vcombine.low %v1055_v8, %v1119_v13  ;;  %v1166_v19 = vrot.slane %v1159_v14, %v3717_v38 }
 0x3ae   : > { %v1135_v15 = vpop.trf.xlu1 }
 0x3af   : > { %v1167_v17 = vcombine.low %v1071_v10, %v1135_v15  ;;  %v1200_v23 = vrot.slane %v1193_v16, %v3717_v38 }
 0x3b0   : > { %v1151_v18 = vpop.trf.xlu0 }
 0x3b1   : > { %v1174_v20 = vrot.slane %v1167_v17, %v3717_v38  ;;  %v1201_v22 = vcombine.low %v1087_v11, %v1151_v18 }
 0x3b3   : > { %v1175_v24 = vcombine.low %v1166_v19, %v1174_v20  ;;  %v1176_v28 = vcombine.high %v1166_v19, %v1174_v20  ;;  %v1208_v29 = vrot.slane %v1201_v22, %v3717_v38 }
 0x3b5   : > { %v1209_v30 = vcombine.low %v1200_v23, %v1208_v29  ;;  %v1210_v32 = vcombine.high %v1200_v23, %v1208_v29  ;;  %v1183_v33 = vrot.slane %v1175_v24, %v3723_v48  ;;  %v1190_v35 = vrot.slane %v1176_v28, %v3723_v48 }
 0x3b7   : > { %v1217_v36 = vrot.slane %v1209_v30, %v3723_v48  ;;  %v1224_v37 = vrot.slane %v1210_v32, %v3723_v48  ;;  %v1231_v45 = vshrl.u32 %v1183_v33, 16  ;;  %v1247_v46 = vshrl.u32 %v1190_v35, 16 }
 0x3b8   : > { %v1191_v47 = vcombine.high %v1183_v33, %v3463_v43  ;;  %v1192_v54 = vcombine.high %v1190_v35, %v3463_v43 }
 0x3b9   : > { %v1245_v39 = vpack.i.b16 %v1224_v37, %v1190_v35  ;;  %v1229_v40 = vpack.i.b16 %v1217_v36, %v1183_v33  ;;  %v1232_v41 = vshrl.u32 %v1217_v36, 16  ;;  %v1248_v42 = vshrl.u32 %v1224_v37, 16 }
 0x3ba   : > { %v1225_v44 = vcombine.high %v1217_v36, %v3463_v43  ;;  %v1226_v52 = vcombine.high %v1224_v37, %v3463_v43  ;;  %v1239_v53 = vshrl.u32 %v1191_v47, 16  ;;  %v1255_v58 = vshrl.u32 %v1192_v54, 16 }
 0x3bb   : > { %1323 = vxpose.xlu0.c.b16.start.end [1/1] (short) (narrow) %v1245_v39, 16  ;;  %1259 = vxpose.xlu1.c.b16.start.end [1/1] (short) (narrow) %v1229_v40, 16  ;;  %v1233_v49 = vpack.i.b16 %v1232_v41, %v1231_v45  ;;  %v1249_v50 = vpack.i.b16 %v1248_v42, %v1247_v46 }
 0x3bc   : > { %v1240_v51 = vshrl.u32 %v1225_v44, 16  ;;  %v1237_v55 = vpack.i.b16 %v1225_v44, %v1191_v47  ;;  %v1256_v57 = vshrl.u32 %v1226_v52, 16  ;;  %v1253_v59 = vpack.i.b16 %v1226_v52, %v1192_v54 }
 0x3be   : > { %v1241_v56 = vpack.i.b16 %v1240_v51, %v1239_v53  ;;  %v1257_v60 = vpack.i.b16 %v1256_v57, %v1255_v58  ;;  %v702_v61 = vpop.permute.xlu1 %701 }
 0x3bf   : > { %1275 = vxpose.xlu0.c.b16.start.end [1/1] (short) (narrow) %v1233_v49, 16  ;;  %1339 = vxpose.xlu1.c.b16.start.end [1/1] (short) (narrow) %v1249_v50, 16 }
 0x3c2   : > { %v708_v63 = vpop.permute.xlu1 %707 }
 0x3c3   : > { %1291 = vxpose.xlu0.c.b16.start.end [1/1] (short) (narrow) %v1237_v55, 16  ;;  %1307 = vxpose.xlu1.c.b16.start.end [1/1] (short) (narrow) %v1241_v56, 16  ;;  %v726_v2 = vcombine.low %v702_v61, %v708_v63  ;;  %v727_v3 = vcombine.high %v702_v61, %v708_v63 }
 0x3c5   : > { %v705_v62 = vpop.permute.xlu0 %704 }
 0x3c6   : > { %v710_v0 = vcombine.low %v3735_v6, %v705_v62  ;;  %v711_v1 = vcombine.high %v3735_v6, %v705_v62 }
 0x3c7   : > { %1355 = vxpose.xlu0.c.b16.start.end [1/1] (short) (narrow) %v1253_v59, 16  ;;  %1371 = vxpose.xlu1.c.b16.start.end [1/1] (short) (narrow) %v1257_v60, 16 }
 0x3c8   : > { %v718_v4 = vrot.slane %v710_v0, %v3717_v38  ;;  %v725_v5 = vrot.slane %v711_v1, %v3717_v38 }
 0x3cb   : > { %883 = vrot.lane.b32.xlu1 %v3704_v25, %s3464_s14  ;;  %v734_v25 = vrot.slane %v726_v2, %v3717_v38 }
 0x3cd   : > { %v743_v7 = vcombine.high %v718_v4, %v734_v25 }
 0x3cf   : > { %885 = vrot.lane.b32.xlu1 %v3707_v26, %s3464_s14  ;;  %v741_v26 = vrot.slane %v727_v3, %v3717_v38  ;;  %v757_v11 = vrot.slane %v743_v7, %v3723_v48 }
 0x3d0   : > { %881 = vrot.lane.b32.xlu0 %v3695_v21, %s3464_s14  ;;  %v742_v21 = vcombine.low %v718_v4, %v734_v25 }
 0x3d1   : > { %v759_v8 = vcombine.high %v725_v5, %v741_v26  ;;  %v775_v16 = vcombine.high %v757_v11, %v3455_v9 }
 0x3d2   : > { %v750_v10 = vrot.slane %v742_v21, %v3723_v48 }
 0x3d3   : > { %v773_v12 = vrot.slane %v759_v8, %v3723_v48 }
 0x3d4   : > { %887 = vrot.lane.b32.xlu0 %v3710_v27, %s3464_s14  ;;  %v758_v27 = vcombine.low %v725_v5, %v741_v26  ;;  %v774_v15 = vcombine.high %v750_v10, %v3455_v9 }
 0x3d5   : > { %v777_v18 = vcombine.high %v773_v12, %v3455_v9  ;;  %v3074_v28 = vpack.c.bf16 %v773_v12, %v757_v11 }
 0x3d6   : > { %v766_v6 = vrot.slane %v758_v27, %v3723_v48 }
 0x3d7   : > { %v3076_v23 = vpack.c.bf16 %v777_v18, %v775_v16  ;;  %v984_v39 = vrot.slane %v3074_v28, %v3717_v38 }
 0x3d8   : > { %v776_v17 = vcombine.high %v766_v6, %v3455_v9  ;;  %v3073_v24 = vpack.c.bf16 %v766_v6, %v750_v10 }
 0x3d9   : > { %v1009_v33 = vrot.slane %v3076_v23, %v3717_v38 }
 0x3da   : > { %v3075_v22 = vpack.c.bf16 %v776_v17, %v774_v15  ;;  %v976_v37 = vrot.slane %v3073_v24, %v3717_v38  ;;  %v1638_v15 = vand.u32 127, %v715_v31 }
 0x3dc   : > { %v1001_v32 = vrot.slane %v3075_v22, %v3717_v38  ;;  %v985_v51 = vcombine.low %v976_v37, %v984_v39  ;;  %vm1639_vm5 = vcmp.le.s32.totalorder %v1638_v15, %v3714_v34 }
 0x3de   : > { %v1010_v45 = vcombine.low %v1001_v32, %v1009_v33  ;;  %v992_v57 = vrot.slane %v985_v51, %v3723_v48 }
 0x3e0   : > { %v1017_v56 = vrot.slane %v1010_v45, %v3723_v48  ;;  %v993_v5 = vcombine.high %v992_v57, %v3463_v43  ;;  %v1022_v8 = vshrl.u32 %v992_v57, 16 }
 0x3e2   : > { %v1018_v1 = vcombine.high %v1017_v56, %v3463_v43  ;;  %v1021_v4 = vpack.i.b16 %v1017_v56, %v992_v57  ;;  %v1023_v27 = vshrl.u32 %v1017_v56, 16 }
 0x3e4   : > { %v1027_v7 = vpack.i.b16 %v1018_v1, %v993_v5  ;;  %v1024_v11 = vpack.i.b16 %v1023_v27, %v1022_v8  ;;  %v1029_v12 = vshrl.u32 %v1018_v1, 16 }
 0x421   : > { %v1331_v13 = vpop.trf.xlu0  ;;  %v1267_v14 = vpop.trf.xlu1 }
 0x422   : > { %v1387_v35 = vcombine.low %v1267_v14, %v1331_v13  ;;  %v1028_v13 = vshrl.u32 %v993_v5, 16 }
 0x424   : > { %v1394_v46 = vrot.slane %v1387_v35, %v3717_v38  ;;  %v1030_v14 = vpack.i.b16 %v1029_v12, %v1028_v13 }
 0x425   : > { %v1283_v19 = vpop.trf.xlu0  ;;  %v1347_v20 = vpop.trf.xlu1 }
 0x426   : > { %v1412_v36 = vcombine.low %v1283_v19, %v1347_v20 }
 0x428   : > { %v1419_v47 = vrot.slane %v1412_v36, %v3717_v38 }
 0x429   : > { %v1299_v29 = vpop.trf.xlu0  ;;  %v1315_v30 = vpop.trf.xlu1 }
 0x42d   : > { %v1363_v40 = vpop.trf.xlu0  ;;  %v1379_v41 = vpop.trf.xlu1 }
 0x42e   : > { %v1395_v42 = vcombine.low %v1299_v29, %v1363_v40  ;;  %v1420_v44 = vcombine.low %v1315_v30, %v1379_v41 }
 0x430   : > { %v1402_v49 = vrot.slane %v1395_v42, %v3717_v38  ;;  %v1427_v50 = vrot.slane %v1420_v44, %v3717_v38 }
 0x432   : > { %v1403_v52 = vcombine.low %v1394_v46, %v1402_v49  ;;  %v1428_v53 = vcombine.low %v1419_v47, %v1427_v50 }
 0x434   : > { %v1410_v54 = vrot.slane %v1403_v52, %v3723_v48  ;;  %v1435_v55 = vrot.slane %v1428_v53, %v3723_v48 }
 0x436   : > { %v1439_v58 = vpack.i.b16 %v1435_v55, %v1410_v54  ;;  %v1411_v59 = vcombine.high %v1410_v54, %v3463_v43  ;;  %v1436_v60 = vcombine.high %v1435_v55, %v3463_v43  ;;  %v1440_v61 = vshrl.u32 %v1410_v54, 16 }
 0x437   : > { %v1441_v62 = vshrl.u32 %v1435_v55, 16 }
 0x438   : > { %v1455_v63 = vsel %vm1453_vm3, %v1439_v58, 0  ;;  %v1445_v0 = vpack.i.b16 %v1436_v60, %v1411_v59  ;;  %v1446_v25 = vshrl.u32 %v1411_v59, 16  ;;  %v1447_v26 = vshrl.u32 %v1436_v60, 16 }
 0x439   : > { %3157 = vmatpush3.bf16.msra.mxu1 %v1455_v63  ;;  %v1442_v2 = vpack.i.b16 %v1441_v62, %v1440_v61 }
 0x43a   : > { %v1547_v3 = vsel %vm1453_vm3, %v1445_v0, 0  ;;  %3162 = vmatprep.subr.bf16.mxu1 %v3455_v9  ;;  %v1448_v10 = vpack.i.b16 %v1447_v26, %v1446_v25 }
 0x43b   : > { %3169 = vmatpush3.bf16.msra.mxu0 %v1547_v3  ;;  %v1501_v21 = vsel %vm1453_vm3, %v1442_v2, 0 }
 0x43c   : > { %3159 = vmatmul.mubr.msk.bf16.vlgmr.msra.gmra.mrb[4].mxu1 %vm1449_vm4, %v1021_v4  ;;  %3180 = vmatprep.subr.bf16.mxu0 %v3455_v9  ;;  %v1593_v6 = vsel %vm1453_vm3, %v1448_v10, 0 }
 0x43d   : > { %3163 = vmatpush3.bf16.msra.mxu1 %v1501_v21  ;;  %3164 = vmatprep.mubr.msk.bf16.mxu1 %vm3456_vm2, %v3455_v9  ;;  %v884_v47 = vpop.permute.xlu1 %883 }
 0x43e   : > { %3171 = vmatmul.mubr.msk.bf16.vlgmr.msra.gmra.mrb[0].mxu0 %vm1449_vm4, %v1027_v7  ;;  %3174 = vmatprep.subr.bf16.mxu1 %v3455_v9 }
 0x43f   : > { %3182 = vmatprep.mubr.msk.bf16.mxu0 %vm3456_vm2, %v3455_v9 }
 0x441   : > { %v886_v50 = vpop.permute.xlu1 %885 }
 0x442   : > { %v882_v46 = vpop.permute.xlu0 %881 }
 0x443   : > { %v893_v52 = vcombine.low %v882_v46, %v886_v50  ;;  %v894_v34 = vcombine.high %v882_v46, %v886_v50 }
 0x444   : > { %3165 = vmatmul.mubr.msk.bf16.vlgmr.msra.gmra.mrb[8].mxu1 %vm1449_vm4, %v1024_v11 }
 0x445   : > { %3175 = vmatpush3.bf16.msra.mxu1 %v1593_v6  ;;  %3176 = vmatprep.mubr.msk.bf16.mxu1 %vm3456_vm2, %v3455_v9  ;;  %v901_v54 = vrot.slane %v893_v52, %v3717_v38  ;;  %v908_v61 = vrot.slane %v894_v34, %v3717_v38 }
 0x446   : > { %3186 = vmatprep.subr.bf16.mxu1 %v3455_v9  ;;  %v888_v49 = vpop.permute.xlu0 %887 }
 0x447   : > { %v909_v51 = vcombine.low %v884_v47, %v888_v49  ;;  %v910_v56 = vcombine.high %v884_v47, %v888_v49 }
 0x449   : > { %v917_v53 = vrot.slane %v909_v51, %v3717_v38  ;;  %v924_v58 = vrot.slane %v910_v56, %v3717_v38 }
 0x44b   : > { %v925_v55 = vcombine.low %v901_v54, %v917_v53  ;;  %v926_v60 = vcombine.high %v901_v54, %v917_v53  ;;  %v941_v0 = vcombine.low %v908_v61, %v924_v58  ;;  %v942_v4 = vcombine.high %v908_v61, %v924_v58 }
 0x44c   : > { %3177 = vmatmul.mubr.msk.bf16.vlgmr.msra.gmra.mrb[12].mxu1 %vm1449_vm4, %v1030_v14 }
 0x44d   : > { %3188 = vmatprep.mubr.msk.bf16.mxu1 %vm3456_vm2, %v3455_v9  ;;  %v933_v57 = vrot.slane %v925_v55, %v3723_v48  ;;  %v940_v63 = vrot.slane %v926_v60, %v3723_v48  ;;  %v949_v3 = vrot.slane %v941_v0, %v3723_v48  ;;  %v956_v25 = vrot.slane %v942_v4, %v3723_v48 }
 0x44f   : > { %v957_v59 = vcombine.high %v933_v57, %v3455_v9  ;;  %v963_v1 = vpack.c.bf16 %v940_v63, %v940_v63  ;;  %v961_v2 = vpack.c.bf16 %v933_v57, %v933_v57  ;;  %v965_v5 = vpack.c.bf16 %v949_v3, %v949_v3 }
 0x450   : > { %v967_v26 = vpack.c.bf16 %v956_v25, %v956_v25  ;;  %v958_v7 = vcombine.high %v940_v63, %v3455_v9  ;;  %v959_v8 = vcombine.high %v949_v3, %v3455_v9  ;;  %v960_v11 = vcombine.high %v956_v25, %v3455_v9 }
 0x451   : > { %v962_v62 = vpack.c.bf16 %v957_v59, %v957_v59 }
 0x452   : > { %v964_v27 = vpack.c.bf16 %v958_v7, %v958_v7  ;;  %v966_v10 = vpack.c.bf16 %v959_v8, %v959_v8  ;;  %v968_v6 = vpack.c.bf16 %v960_v11, %v960_v11 }
 0x50f   : > { %v1491_v16 = vpop.f32.mrb[4].mxu1 }
 0x510   : > { %v3813_v17 = vsel %vm1639_vm5, %v1491_v16, -1e+30  ;;  %v3160_v18 = vpop.f32.mrb[5].mxu1 }
 0x511   : > { %v1494_v19 = vpop.f32.mrb[6].mxu1  ;;  %v1583_v20 = vpop.f32.mrb[0].mxu0  ;;  %v1646_v22 = vsel %vm1449_vm4, %v3813_v17, -inf }
 0x512   : > { %v3819_v23 = vsel %vm1639_vm5, %v1583_v20, -1e+30  ;;  %v3172_v24 = vpop.f32.mrb[1].mxu0  ;;  %1647 = vmax.xlane.f32.xlu0 %v1646_v22  ;;  %v3161_v31 = vpop.f32.mrb[7].mxu1 }
 0x513   : > { %v1586_v28 = vpop.f32.mrb[2].mxu0  ;;  %v1652_v30 = vsel %vm1449_vm4, %v3819_v23, -inf }
 0x514   : > { %v3173_v29 = vpop.f32.mrb[3].mxu0 }
 0x516   : > { %1653 = vmax.xlane.f32.xlu0 %v1652_v30 }
 0x517   : > { %v1537_v32 = vpop.f32.mrb[8].mxu1 }
 0x518   : > { %v3825_v33 = vsel %vm1639_vm5, %v1537_v32, -1e+30  ;;  %v3166_v35 = vpop.f32.mrb[9].mxu1 }
 0x519   : > { %v1540_v36 = vpop.f32.mrb[10].mxu1  ;;  %v1649_v37 = vsel %vm1449_vm4, %v3825_v33, -inf }
 0x51a   : > { %1650 = vmax.xlane.f32.xlu1 %v1649_v37  ;;  %v3167_v39 = vpop.f32.mrb[11].mxu1 }
 0x51f   : > { %v1629_v40 = vpop.f32.mrb[12].mxu1 }
 0x520   : > { %v3831_v41 = vsel %vm1639_vm5, %v1629_v40, -1e+30  ;;  %v3178_v42 = vpop.f32.mrb[13].mxu1 }
 0x521   : > { %v1632_v44 = vpop.f32.mrb[14].mxu1  ;;  %v1655_v21 = vsel %vm1449_vm4, %v3831_v41, -inf }
 0x522   : > { %v3179_v45 = vpop.f32.mrb[15].mxu1 }
 0x543   : > { %1710 = vxpose.xlu0.c.b16.start.end [1/1] (short) (narrow) %v962_v62, 16 }
 0x547   : > { %1726 = vxpose.xlu0.c.b16.start.end [1/1] (short) (narrow) %v963_v1, 16  ;;  %1694 = vxpose.xlu1.c.b16.start.end [1/1] (short) (narrow) %v961_v2, 16 }
 0x54b   : > { %1758 = vxpose.xlu0.c.b16.start.end [1/1] (short) (narrow) %v965_v5, 16 }
 0x54f   : > { %1790 = vxpose.xlu0.c.b16.start.end [1/1] (short) (narrow) %v967_v26, 16 }
 0x554   : > { %1656 = vmax.xlane.f32.xlu1 %v1655_v21 }
 0x581   : > { %1742 = vxpose.xlu1.c.b16.start.end [1/1] (short) (narrow) %v964_v27, 16 }
 0x585   : > { %1774 = vxpose.xlu1.c.b16.start.end [1/1] (short) (narrow) %v966_v10, 16 }
 0x589   : > { %1806 = vxpose.xlu1.c.b16.start.end [1/1] (short) (narrow) %v968_v6, 16 }
 0x59f   : > { %v1648_v12 = vpop.xlane.xlu0 %1647 }
 0x5a0   : > { %v1658_v55 = vsub.f32 %v3813_v17, %v1648_v12 }
 0x5a2   : > { %v1662_v62 = vmul.f32 1.442695, %v1658_v55 }
 0x5a3   : > { %v1654_v13 = vpop.xlane.xlu0 %1653 }
 0x5a4   : > { %v1660_v63 = vsub.f32 %v3819_v23, %v1654_v13  ;;  %3340 = vpow2.f32 %v1662_v62 }
 0x5a6   : > { %v1666_v5 = vmul.f32 1.442695, %v1660_v63 }
 0x5a7   : > { %v1651_v16 = vpop.xlane.xlu1 %1650 }
 0x5a8   : > { %v1659_v58 = vsub.f32 %v3825_v33, %v1651_v16 }
 0x5a9   : > { %v1718_v14 = vpop.trf.xlu0 }
 0x5aa   : > { %v1664_v2 = vmul.f32 1.442695, %v1659_v58 }
 0x5ac   : > { %3342 = vpow2.f32 %v1664_v2 }
 0x5ad   : > { %v1734_v15 = vpop.trf.xlu0  ;;  %v1702_v18 = vpop.trf.xlu1  ;;  %3344 = vpow2.f32 %v1666_v5 }
 0x5ae   : > { %v3341_v26 = vpop.eup %3340 }
 0x5af   : > { %v1670_v21 = vsel %vm1449_vm4, %v3341_v26, 0.0 }
 0x5b1   : > { %v1766_v19 = vpop.trf.xlu0 }
 0x5b2   : > { %v1822_v24 = vcombine.low %v1702_v18, %v1766_v19 }
 0x5b4   : > { %v1829_v29 = vrot.slane %v1822_v24, %v3717_v38 }
 0x5b5   : > { %v1798_v22 = vpop.trf.xlu0 }
 0x5b6   : > { %v1830_v31 = vcombine.low %v1734_v15, %v1798_v22  ;;  %v3343_v23 = vpop.eup %3342 }
 0x5b7   : > { %v3345_v7 = vpop.eup %3344 }
 0x5b8   : > { %v1837_v30 = vrot.slane %v1830_v31, %v3717_v38  ;;  %v1676_v8 = vsel %vm1449_vm4, %v3345_v7, 0.0 }
 0x5ba   : > { %v1838_v36 = vcombine.low %v1829_v29, %v1837_v30  ;;  %v1839_v49 = vcombine.high %v1829_v29, %v1837_v30 }
 0x5bc   : > { %v1846_v44 = vrot.slane %v1838_v36, %v3723_v48  ;;  %v1853_v61 = vrot.slane %v1839_v49, %v3723_v48 }
 0x5be   : > { %v1894_v50 = vshrl.u32 %v1846_v44, 16  ;;  %v1854_v53 = vcombine.high %v1846_v44, %v3463_v43  ;;  %v1910_v4 = vshrl.u32 %v1853_v61, 16  ;;  %v1855_v6 = vcombine.high %v1853_v61, %v3463_v43 }
 0x5c0   : > { %v1902_v60 = vshrl.u32 %v1854_v53, 16 }
 0x5e1   : > { %v1657_v20 = vpop.xlane.xlu1 %1656 }
 0x5e2   : > { %v1661_v17 = vsub.f32 %v3831_v41, %v1657_v20  ;;  %v1673_v41 = vsel %vm1449_vm4, %v3343_v23, 0.0 }
 0x5e4   : > { %v1668_v25 = vmul.f32 1.442695, %v1661_v17 }
 0x5e6   : > { %3346 = vpow2.f32 %v1668_v25 }
 0x5e7   : > { %v1750_v28 = vpop.trf.xlu1 }
 0x5eb   : > { %v1782_v32 = vpop.trf.xlu1 }
 0x5ec   : > { %v1856_v35 = vcombine.low %v1718_v14, %v1782_v32  ;;  %v1918_v14 = vshrl.u32 %v1855_v6, 16 }
 0x5ee   : > { %v1863_v40 = vrot.slane %v1856_v35, %v3717_v38 }
 0x5ef   : > { %v1814_v37 = vpop.trf.xlu1 }
 0x5f0   : > { %v1864_v39 = vcombine.low %v1750_v28, %v1814_v37  ;;  %v3347_v27 = vpop.eup %3346 }
 0x5f1   : > { %v1679_v10 = vsel %vm1449_vm4, %v3347_v27, 0.0 }
 0x5f2   : > { %v1871_v42 = vrot.slane %v1864_v39, %v3717_v38 }
 0x5f4   : > { %v1872_v45 = vcombine.low %v1863_v40, %v1871_v42  ;;  %v1873_v46 = vcombine.high %v1863_v40, %v1871_v42 }
 0x5f6   : > { %v1880_v47 = vrot.slane %v1872_v45, %v3723_v48  ;;  %v1887_v34 = vrot.slane %v1873_v46, %v3723_v48 }
 0x5f8   : > { %v1892_v51 = vpack.i.b16 %v1880_v47, %v1846_v44  ;;  %v1895_v52 = vshrl.u32 %v1880_v47, 16  ;;  %v1888_v54 = vcombine.high %v1880_v47, %v3463_v43  ;;  %v1911_v1 = vshrl.u32 %v1887_v34, 16 }
 0x5f9   : > { %v1908_v3 = vpack.i.b16 %v1887_v34, %v1853_v61  ;;  %v1889_v11 = vcombine.high %v1887_v34, %v3463_v43 }
 0x5fa   : > { %1922 = vxpose.xlu0.c.b16.start.end [1/1] (short) (narrow) %v1892_v51, 16  ;;  %v1896_v56 = vpack.i.b16 %v1895_v52, %v1894_v50  ;;  %v1903_v57 = vshrl.u32 %v1888_v54, 16  ;;  %v1900_v59 = vpack.i.b16 %v1888_v54, %v1854_v53  ;;  %v1912_v33 = vpack.i.b16 %v1911_v1, %v1910_v4 }
 0x5fb   : > { %v1919_v12 = vshrl.u32 %v1889_v11, 16  ;;  %v1916_v13 = vpack.i.b16 %v1889_v11, %v1855_v6 }
 0x5fc   : > { %1938 = vxpose.xlu1.c.b16.start.end [1/1] (short) (narrow) %v1896_v56, 16  ;;  %v1904_v0 = vpack.i.b16 %v1903_v57, %v1902_v60 }
 0x5fd   : > { %v1920_v15 = vpack.i.b16 %v1919_v12, %v1918_v14 }
 0x5fe   : > { %1954 = vxpose.xlu0.c.b16.start.end [1/1] (short) (narrow) %v1900_v59, 16 }
 0x600   : > { %1970 = vxpose.xlu1.c.b16.start.end [1/1] (short) (narrow) %v1904_v0, 16 }
 0x602   : > { %1986 = vxpose.xlu0.c.b16.start.end [1/1] (short) (narrow) %v1908_v3, 16 }
 0x604   : > { %2002 = vxpose.xlu1.c.b16.start.end [1/1] (short) (narrow) %v1912_v33, 16 }
 0x60f   : > { %1671 = vadd.xlane.f32.xlu0 %v1670_v21 }
 0x611   : > { %1674 = vadd.xlane.f32.xlu1 %v1673_v41 }
 0x613   : > { %1677 = vadd.xlane.f32.xlu0 %v1676_v8 }
 0x615   : > { %1680 = vadd.xlane.f32.xlu1 %v1679_v10 }
 0x640   : > { %2018 = vxpose.xlu0.c.b16.start.end [1/1] (short) (narrow) %v1916_v13, 16 }
 0x642   : > { %2034 = vxpose.xlu1.c.b16.start.end [1/1] (short) (narrow) %v1920_v15, 16 }
 0x660   : > { %v1930_v16 = vpop.trf.xlu0 }
 0x662   : > { %v1946_v18 = vpop.trf.xlu1 }
 0x664   : > { %v1962_v19 = vpop.trf.xlu0 }
 0x666   : > { %v1978_v20 = vpop.trf.xlu1 }
 0x668   : > { %v1994_v22 = vpop.trf.xlu0 }
 0x669   : > { %v2050_v32 = vcombine.low %v1930_v16, %v1994_v22 }
 0x66a   : > { %v2010_v24 = vpop.trf.xlu1 }
 0x66b   : > { %v2075_v37 = vcombine.low %v1946_v18, %v2010_v24  ;;  %v2057_v45 = vrot.slane %v2050_v32, %v3717_v38 }
 0x66d   : > { %v2082_v52 = vrot.slane %v2075_v37, %v3717_v38 }
 0x69c   : > { %v1672_v31 = vpop.xlane.xlu0 %1671 }
 0x69d   : > { %3348 = vrcp.f32 %v1672_v31 }
 0x69e   : > { %v1675_v28 = vpop.xlane.xlu1 %1674 }
 0x69f   : > { %3350 = vrcp.f32 %v1675_v28 }
 0x6a0   : > { %v1678_v29 = vpop.xlane.xlu0 %1677 }
 0x6a1   : > { %3352 = vrcp.f32 %v1678_v29 }
 0x6a2   : > { %v1681_v30 = vpop.xlane.xlu1 %1680 }
 0x6a3   : > { %3354 = vrcp.f32 %v1681_v30 }
 0x6a6   : > { %v2026_v35 = vpop.trf.xlu0 }
 0x6a7   : > { %v3349_v36 = vpop.eup %3348  ;;  %v2058_v39 = vcombine.low %v1962_v19, %v2026_v35 }
 0x6a8   : > { %v2042_v40 = vpop.trf.xlu1  ;;  %v1686_v42 = vmul.f32 %v3349_v36, %v3341_v26 }
 0x6a9   : > { %v3351_v44 = vpop.eup %3350  ;;  %v2065_v46 = vrot.slane %v2058_v39, %v3717_v38  ;;  %v2083_v47 = vcombine.low %v1978_v20, %v2042_v40 }
 0x6aa   : > { %v1690_v49 = vpack.c.bf16 %v1686_v42, %v1686_v42  ;;  %v1687_v50 = vmul.f32 %v3351_v44, %v3343_v23 }
 0x6ab   : > { %v3353_v51 = vpop.eup %3352  ;;  %v2066_v53 = vcombine.low %v2057_v45, %v2065_v46  ;;  %v2090_v54 = vrot.slane %v2083_v47, %v3717_v38 }
 0x6ac   : > { %v2116_v55 = vsel %vm1449_vm4, %v1690_v49, 0  ;;  %v1691_v56 = vpack.c.bf16 %v1687_v50, %v1687_v50  ;;  %v1688_v57 = vmul.f32 %v3353_v51, %v3345_v7  ;;  %v3326_v49 = vld [vmem:[%s3632_s24] sm:$0xff]  }
 0x6ad   : > { %v3355_v34 = vpop.eup %3354  ;;  %v2073_v58 = vrot.slane %v2066_v53, %v3723_v48  ;;  %v2091_v59 = vcombine.low %v2082_v52, %v2090_v54  ;;  %3181 = vmatpush3.bf16.xpose.msra.mxu0 %v2116_v55 }
 0x6ae   : > { %v2162_v60 = vsel %vm1449_vm4, %v1691_v56, 0  ;;  %3192 = vmatprep.subr.bf16.mxu0 %v3455_v9  ;;  %v1689_v61 = vmul.f32 %v3355_v34, %v3347_v27  ;;  %v1692_v63 = vpack.c.bf16 %v1688_v57, %v1688_v57  ;;  %v3327_v34 = vld [vmem:[%s3632_s24 + $0x8] sm:$0xff]   ;;  %s3465_s24 = smov 16  }
 0x6af   : > { %v2098_v62 = vrot.slane %v2091_v59, %v3723_v48  ;;  %3187 = vmatpush3.bf16.xpose.msra.mxu1 %v2162_v60  ;;  %v2103_v0 = vshrl.u32 %v2073_v58, 16  ;;  %v2074_v33 = vcombine.high %v2073_v58, %v3463_v43 }
 0x6b0   : > { %3198 = vmatprep.subr.bf16.mxu1 %v3455_v9  ;;  %v1693_v17 = vpack.c.bf16 %v1689_v61, %v1689_v61  ;;  %v2208_v5 = vsel %vm1449_vm4, %v1692_v63, 0 }
 0x6b1   : > { %v2102_v1 = vpack.i.b16 %v2098_v62, %v2073_v58  ;;  %v2104_v2 = vshrl.u32 %v2098_v62, 16  ;;  %v2099_v4 = vcombine.high %v2098_v62, %v3463_v43  ;;  %v2109_v23 = vshrl.u32 %v2074_v33, 16 }
 0x6b2   : > { %v2254_v25 = vsel %vm1449_vm4, %v1693_v17, 0 }
 0x6b3   : > { %v2105_v3 = vpack.i.b16 %v2104_v2, %v2103_v0  ;;  %v2110_v26 = vshrl.u32 %v2099_v4, 16  ;;  %v2108_v21 = vpack.i.b16 %v2099_v4, %v2074_v33 }
 0x6b4   : > { %3183 = vmatmul.mubr.msk.bf16.vlgmr.msra.gmra.mrb[4].mxu0 %vm1449_vm4, %v2102_v1 }
 0x6b5   : > { %3193 = vmatpush3.bf16.xpose.msra.mxu0 %v2208_v5  ;;  %3194 = vmatprep.mubr.msk.bf16.mxu0 %vm3456_vm2, %v3455_v9  ;;  %v2111_v7 = vpack.i.b16 %v2110_v26, %v2109_v23 }
 0x6b6   : > { %3189 = vmatmul.mubr.msk.bf16.vlgmr.msra.gmra.mrb[16].mxu1 %vm1449_vm4, %v2105_v3  ;;  %3204 = vmatprep.subr.bf16.mxu0 %v3455_v9 }
 0x6b7   : > { %3199 = vmatpush3.bf16.xpose.msra.mxu1 %v2254_v25  ;;  %3200 = vmatprep.mubr.msk.bf16.mxu1 %vm3456_vm2, %v3455_v9 }
 0x6b8   : > { %3212 = vmatprep.subr.bf16.mxu1 %v3455_v9 }
 0x6bc   : > { %3195 = vmatmul.mubr.msk.bf16.vlgmr.msra.gmra.mrb[8].mxu0 %vm1449_vm4, %v2108_v21 }
 0x6bd   : > { %3208 = vmatprep.mubr.msk.bf16.mxu0 %vm3456_vm2, %v3455_v9  ;;  %3205 = vmatpush3.bf16.msra.mxu0 %v3326_v49 }
 0x6be   : > { %3201 = vmatmul.mubr.msk.bf16.vlgmr.msra.gmra.mrb[20].mxu1 %vm1449_vm4, %v2111_v7  ;;  %3206 = vmatprep.subr.bf16.mxu0 %v3455_v9 }
 0x6bf   : > { %3216 = vmatprep.mubr.msk.bf16.mxu1 %vm3456_vm2, %v3455_v9 }
 0x6c1   : > { %3207 = vmatpush3.bf16.msra.mxu0 %v3327_v34 }
 0x6c2   : > { %3220 = vmatprep.subr.bf16.mxu0 %v3455_v9 }
 0x787   : > { %v2152_v43 = vpop.f32.mrb[4].mxu0 }
 0x788   : > { %2296 = vxpose.xlu0.b32.start.end [1/1] (short) (narrow) %v2152_v43, 8  ;;  %v3184_v41 = vpop.f32.mrb[5].mxu0 }
 0x789   : > { %v2155_v27 = vpop.f32.mrb[6].mxu0  ;;  %v2198_v8 = vpop.f32.mrb[16].mxu1 }
 0x78a   : > { %v3185_v10 = vpop.f32.mrb[7].mxu0  ;;  %2328 = vxpose.xlu1.b32.start.end [1/1] (short) (narrow) %v2198_v8, 8  ;;  %v3190_v11 = vpop.f32.mrb[17].mxu1  ;;  %v3090_v8 = vld [vmem:[%s4086_s27] ss:$0 sm:$0xff] }
 0x78b   : > { %v2201_v6 = vpop.f32.mrb[18].mxu1  ;;  %v3358_v10 = vld [vmem:[%s3665_s16] sm:$0xff] }
 0x78c   : > { %v3191_v12 = vpop.f32.mrb[19].mxu1 }
 0x78f   : > { %v2244_v13 = vpop.f32.mrb[8].mxu0 }
 0x790   : > { %2360 = vxpose.xlu0.b32.start.end [1/1] (short) (narrow) %v2244_v13, 8  ;;  %v3196_v14 = vpop.f32.mrb[9].mxu0 }
 0x791   : > { %v2247_v15 = vpop.f32.mrb[10].mxu0  ;;  %v2290_v16 = vpop.f32.mrb[20].mxu1 }
 0x792   : > { %v3197_v18 = vpop.f32.mrb[11].mxu0  ;;  %v3202_v19 = vpop.f32.mrb[21].mxu1 }
 0x793   : > { %v2293_v20 = vpop.f32.mrb[22].mxu1 }
 0x794   : > { %2392 = vxpose.xlu0.b32.start.end [1/1] (short) (narrow) %v2290_v16, 8  ;;  %v3203_v22 = vpop.f32.mrb[23].mxu1 }
 0x808   : > { %v2312_v24 = vpop.trf.xlu0 }
 0x80a   : > { %v2344_v28 = vpop.trf.xlu1 }
 0x810   : > { %v2376_v31 = vpop.trf.xlu0 }
 0x811   : > { %v2424_v29 = vcombine.low %v2312_v24, %v2376_v31  ;;  %v2425_v30 = vcombine.high %v2312_v24, %v2376_v31  ;;  %v3328_v24 = vld [vmem:[%s3649_s0] sm:$0xff]   ;;  %v3329_v31 = vld [vmem:[%s3649_s0 + $0x8] sm:$0xff]   ;;  %s3468_s0 = smov [#allocation2]  }
 0x812   : > { %3213 = vmatpush3.bf16.msra.mxu1 %v3328_v24  ;;  %s3363_s28 = sshll.u32 %s3468_s0, 4  ;;  %s3364_s28 = int_to_ptr.vmem [resolvable:$false] %s3363_s28 }
 0x813   : > { %v2432_v37 = vrot.slane %v2424_v29, %v3717_v38  ;;  %v2439_v39 = vrot.slane %v2425_v30, %v3717_v38  ;;  %3214 = vmatprep.subr.bf16.mxu1 %v3455_v9  ;;  %v3331_v29 = vld [vmem:[%s3659_s26 + $0x8] sm:$0xff]   ;;  %v3332_v30 = vld [vmem:[%s3659_s26 + $0x10] sm:$0xff]   ;;  %s3365_s22 = scalar_lea.vmem %s3364_s28, 256 }
 0x814   : > { %v2408_v32 = vpop.trf.xlu0 }
 0x815   : > { %v2440_v35 = vcombine.low %v2344_v28, %v2408_v32  ;;  %v2441_v36 = vcombine.high %v2344_v28, %v2408_v32  ;;  %v3330_v28 = vld [vmem:[%s3659_s26] sm:$0xff]   ;;  %v3333_v32 = vld [vmem:[%s3659_s26 + $0x18] sm:$0xff]  }
 0x816   : > { %3215 = vmatpush3.bf16.msra.mxu1 %v3329_v31 }
 0x817   : > { %v2448_v40 = vrot.slane %v2440_v35, %v3717_v38  ;;  %v2455_v42 = vrot.slane %v2441_v36, %v3717_v38  ;;  %v3334_v35 = vld [vmem:[%s3659_s26 + $0x20] sm:$0xff]   ;;  %v3335_v36 = vld [vmem:[%s3659_s26 + $0x28] sm:$0xff]  }
 0x819   : > { %v2456_v44 = vcombine.low %v2432_v37, %v2448_v40  ;;  %v2457_v45 = vcombine.high %v2432_v37, %v2448_v40  ;;  %v2472_v46 = vcombine.low %v2439_v39, %v2455_v42  ;;  %v2473_v47 = vcombine.high %v2439_v39, %v2455_v42 }
 0x81b   : > { %v2464_v50 = vrot.slane %v2456_v44, %v3723_v48  ;;  %v2471_v51 = vrot.slane %v2457_v45, %v3723_v48  ;;  %v2480_v52 = vrot.slane %v2472_v46, %v3723_v48  ;;  %v2487_v53 = vrot.slane %v2473_v47, %v3723_v48  ;;  %v3091_v44 = vld [vmem:[%s579_s23] ss:$0 sm:$0xff] }
 0x81c   : > { %v3092_v46 = vld [vmem:[%s4087_s29] ss:$0 sm:$0xff] }
 0x81d   : > { %v2492_v54 = vcombine.low %v2464_v50, %v2471_v51  ;;  %v3085_v55 = vcombine.high %v2464_v50, %v2471_v51  ;;  %v2508_v56 = vcombine.low %v2480_v52, %v2487_v53  ;;  %v3086_v57 = vcombine.high %v2480_v52, %v2487_v53  ;;  %v3336_v51 = vld [vmem:[%s3659_s26 + $0x30] sm:$0xff]   ;;  %v3337_v52 = vld [vmem:[%s3659_s26 + $0x38] sm:$0xff]   ;;  %v3093_v53 = vld [vmem:[%s590_s3] ss:$0 sm:$0xff] }
 0x81f   : > { %v2499_v58 = vrot.slane %v2492_v54, %v3717_v38  ;;  %v2507_v59 = vrot.slane %v3085_v55, %v3717_v38  ;;  %v2515_v60 = vrot.slane %v2508_v56, %v3717_v38  ;;  %v2523_v61 = vrot.slane %v3086_v57, %v3717_v38 }
 0x821   : > { %v2525_v62 = vcombine.high %v2499_v58, %v2507_v59  ;;  %v2541_v63 = vcombine.high %v2515_v60, %v2523_v61  ;;  %v2524_v0 = vcombine.low %v2499_v58, %v2507_v59  ;;  %v2540_v1 = vcombine.low %v2515_v60, %v2523_v61 }
 0x823   : > { %v2539_v2 = vrot.slane %v2525_v62, %v3723_v48  ;;  %v2555_v17 = vrot.slane %v2541_v63, %v3723_v48  ;;  %v2532_v3 = vrot.slane %v2524_v0, %v3723_v48  ;;  %v2548_v4 = vrot.slane %v2540_v1, %v3723_v48 }
 0x825   : > { %v2558_v5 = vcombine.low %v2539_v2, %v2555_v17  ;;  %v2557_v33 = vcombine.high %v2532_v3, %v2548_v4  ;;  %v2556_v25 = vcombine.low %v2532_v3, %v2548_v4  ;;  %v2559_v38 = vcombine.high %v2539_v2, %v2555_v17 }
 0x827   : > { %2565 = vrot.lane.b32.xlu1 %v2558_v5, %s3465_s24  ;;  %2561 = vrot.lane.b32.xlu0 %v2557_v33, %s3466_s17  ;;  %s3107_s24 = sshll.u32 %s4088_s12, 7  ;;  %s2871_s17 = sshll.u32 %s3665_s16, 4  ;;  %s3978_s17 = int_to_ptr.vmem [resolvable:$true] %s2871_s17 }
 0x828   : > { %s3976_s4 = scalar_lea.hbm %s4091_s18, %s3107_s24  ;;  %s3359_s27 = scalar_lea.vmem %s3978_s17, 128 }
 0x829   : > { %p3360_p1 = scmp.ne.s32.totalorder %s3978_s17, %s3359_s27  ;;  %p3366_p5 = scmp.lt.s32.totalorder %s3978_s17, %s3364_s28 }
 0x82a   : > { %p3367_p6 = scmp.lt.s32.totalorder %s3365_s22, %s3359_s27 }
 0x82b   : > { %2569 = vrot.lane.b32.xlu1 %v2559_v38, %s3467_s20  ;;  %p3361_p2 = pnand %p3360_p1, %p3583_p3 }
 0x82c   : > { %p3368_p7 = por %p3367_p6, %p3366_p5 }
 0x82d   : > { %p3362_p4 = pneg %p3361_p2 }
 0x82f   : > { %p3369_p8 = pnand %p3368_p7, %p3362_p4 }
 0x899   : > { %v2566_v26 = vpop.permute.xlu1 %2565  ;;  %v2562_v23 = vpop.permute.xlu0 %2561 }
 0x89a   : > { %v2572_v21 = vsel %vm1449_vm4, %v2556_v25, %v2562_v23 }
 0x89b   : > { %v2574_v48 = vsel %vm2573_vm6, %v2572_v21, %v2566_v26 }
 0x89d   : > { %v2570_v7 = vpop.permute.xlu1 %2569 }
 0x89e   : > { %v2576_v43 = vsel %vm2575_vm7, %v2574_v48, %v2570_v7 }
 0x89f   : > { %v2577_v41 = vpack.c.bf16 %v2576_v43, %v2576_v43 }
 0x8a1   : > { %3209 = vmatmul.mubr.msk.bf16.vlgmr.msra.gmra.mrb[12].mxu0 %vm610_vm1, %v2577_v41 }
 0x8a2   : > { %3236 = vmatprep.mubr.msk.bf16.mxu0 %vm3456_vm2, %v3455_v9  ;;  %3221 = vmatpush3.bf16.msra.mxu0 %v3330_v28 }
 0x8a3   : > { %3222 = vmatprep.subr.bf16.mxu0 %v3455_v9 }
 0x8a6   : > { %3223 = vmatpush3.bf16.msra.mxu0 %v3331_v29 }
 0x8a7   : > { %3224 = vmatprep.subr.bf16.mxu0 %v3455_v9 }
 0x8aa   : > { %3225 = vmatpush3.bf16.msra.mxu0 %v3332_v30 }
 0x8ab   : > { %3226 = vmatprep.subr.bf16.mxu0 %v3455_v9 }
 0x8ae   : > { %3227 = vmatpush3.bf16.msra.mxu0 %v3333_v32 }
 0x8af   : > { %3228 = vmatprep.subr.bf16.mxu0 %v3455_v9 }
 0x8b2   : > { %3229 = vmatpush3.bf16.msra.mxu0 %v3334_v35 }
 0x8b3   : > { %3230 = vmatprep.subr.bf16.mxu0 %v3455_v9 }
 0x8b6   : > { %3231 = vmatpush3.bf16.msra.mxu0 %v3335_v36 }
 0x8b7   : > { %3232 = vmatprep.subr.bf16.mxu0 %v3455_v9 }
 0x8ba   : > { %3233 = vmatpush3.bf16.msra.mxu0 %v3336_v51 }
 0x8bb   : > { %3234 = vmatprep.subr.bf16.mxu0 %v3455_v9  ;;  %v3097_v9 = vld [vmem:[%s598_s21] ss:$0 sm:$0xff]  ;;  %s2858_s21 = scalar_lea.sflag [#allocation3], %s4092_s13 }
 0x8be   : > { %3235 = vmatpush3.bf16.msra.mxu0 %v3337_v52 }
 0x974   : > { %v2631_v27 = vpop.f32.mrb[12].mxu0 }
 0x975   : > { %v2637_v11 = vadd.f32 %v3358_v10, %v2631_v27  ;;  %v3210_v6 = vpop.f32.mrb[13].mxu0 }
 0x976   : > { %v2634_v12 = vpop.f32.mrb[14].mxu0 }
 0x977   : > { %v3925_v13 = vadd.f32 %v3090_v8, %v2637_v11  ;;  %v3211_v14 = vpop.f32.mrb[15].mxu0 }
 0x979   : > { %v2648_v15 = vsel %vm610_vm1, %v3925_v13, 0.0 }
 0x97a   : > { %2649 = vadd.xlane.f32.xlu1 %v2648_v15 }
 0xa07   : > { %v2650_v16 = vpop.xlane.xlu1 %2649 }
 0xa08   : > { %v2651_v18 = vmul.f32 0.03125, %v2650_v16 }
 0xa0a   : > { %v2652_v19 = vsub.f32 %v3925_v13, %v2651_v18 }
 0xa0c   : > { %v2653_v20 = vmul.f32 %v2652_v19, %v2652_v19 }
 0xa0e   : > { %v2654_v22 = vsel %vm610_vm1, %v2653_v20, 0.0 }
 0xa0f   : > { %2655 = vadd.xlane.f32.xlu0 %v2654_v22 }
 0xa9c   : > { %v2656_v37 = vpop.xlane.xlu0 %2655 }
 0xa9d   : > { %v2657_v39 = vmul.f32 0.03125, %v2656_v37 }
 0xa9f   : > { %v2658_v40 = vadd.f32 1e-05, %v2657_v39 }
 0xaa1   : > { %3356 = vrsqrt.f32 %v2658_v40 }
 0xaab   : > { %v3357_v42 = vpop.eup %3356 }
 0xaac   : > { %v2660_v45 = vmul.f32 %v3357_v42, %v2652_v19 }
 0xaae   : > { %v2667_v47 = vmul.f32 %v3091_v44, %v2660_v45 }
 0xab0   : > { %v2674_v49 = vadd.f32 %v3092_v46, %v2667_v47 }
 0xab2   : > { %v2675_v50 = vpack.c.bf16 %v2674_v49, %v2674_v49 }
 0xab4   : > { %3217 = vmatmul.mubr.msk.bf16.vlgmr.msra.gmra.mrb[24].mxu1 %vm610_vm1, %v2675_v50 }
 0xb87   : > { %v2736_v54 = vpop.f32.mrb[24].mxu1 }
 0xb88   : > { %v2737_v55 = vadd.f32 %v3093_v53, %v2736_v54  ;;  %v3218_v56 = vpop.f32.mrb[25].mxu1 }
 0xb89   : > { %v2739_v57 = vpop.f32.mrb[26].mxu1 }
 0xb8a   : > { %v2742_v34 = vmax.f32 %v2737_v55, 0.0  ;;  %v3219_v58 = vpop.f32.mrb[27].mxu1 }
 0xb8c   : > { %v2743_v59 = vpack.c.bf16 %v2742_v34, %v2742_v34 }
 0xb8e   : > { %3237 = vmatmul.mubr.bf16.vlgmr.msra.gmra.mrb[16].mxu0 %v2743_v59 }
 0xc61   : > { %v2849_v60 = vpop.f32.mrb[16].mxu0 }
 0xc62   : > { %v2850_v61 = vadd.f32 %v3097_v9, %v2849_v60  ;;  %v3238_v62 = vpop.f32.mrb[17].mxu0 }
 0xc63   : > { %v2852_v63 = vpop.f32.mrb[18].mxu0 }
 0xc64   : > { %v2855_v0 = vadd.f32 %v2850_v61, %v3925_v13  ;;  %v3239_v1 = vpop.f32.mrb[19].mxu0 }
 0xc66   : > { %2856 = vst.msk [vmem:[%s3665_s16] sm:$0xff] %vm610_vm1, %v2855_v0 }
 0xc67   : > { %3372 = shalt.err (!%p3369_p8)
}
 0xc68   : > { %s3373_s16 = scalar_lea.hbm %s3976_s4, 128  ;;  %s3377_s12 = scalar_lea.hbm %s4091_s18, 256 }
 0xc69   : > { %p3374_p10 = scmp.ne.s32.totalorder %s3976_s4, %s3373_s16  ;;  %p3378_p13 = scmp.lt.u32.totalorder %s3976_s4, %s4091_s18 }
 0xc6a   : > { %p3379_p0 = scmp.lt.u32.totalorder %s3377_s12, %s3373_s16  ;;  %p3381_p2 = scmp.lt.u32.totalorder %s3373_s16, %s3976_s4 }
 0xc6b   : > { %p3375_p11 = pnand %p3374_p10, %p3583_p3 }
 0xc6c   : > { %p3380_p1 = por %p3379_p0, %p3378_p13 }
 0xc6d   : > { %p3376_p12 = pneg %p3375_p11 }
 0xc6e   : > { %p3382_p4 = por %p3381_p2, %p3380_p1 }
 0xc70   : > { %p3383_p5 = pnand %p3382_p4, %p3376_p12 }
 0xc72   : > { %3386 = shalt.err (!%p3383_p5)
}
 0xc73   : > { %3240 = dma.vmem_to_hbm [thread:$0]  (%p3583_p3), %s3978_s17, 128, %s3976_s4, %s2858_s21  }
 0xc74 PF: > { %s4093_s25 = sld [smem:[#allocation12_spill]]  ;;  %s4094_s30 = sld [smem:[#allocation5_spill]] }
 0xc7a   : > { %p3246_p6 = scmp.ge.s32.totalorder %s4093_s25, 2  ;;  %s2883_s24 = sand.u32 1, %s4094_s30  }
 0xc7b   : > { %s2884_s3 = scalar_lea.sflag [#allocation3], %s2883_s24 }
 0xc7c   : > { %p3243_p7 = pnand %p3246_p6, %p3593_p9 }
 0xc7e   : > { %3420 = dma.done.wait (!%p3243_p7), %s2884_s3, 128  }
 0xc7f   : > { %3422 = vsyncadd (!%p3243_p7), %s2884_s3, 4294967168  ;;  %s25_s28 = sadd.s32 1, %s4093_s25   ;;  %s4096_s21 = sld [smem:[#allocation6_spill]] }
 0xc80   : > { %p22_p8 = scmp.ge.s32.totalorder %s25_s28, 6   ;;  %s4097_s22 = sld [smem:[#allocation7_spill]] }
 0xc81   : > { %s4098_s23 = sld [smem:[#allocation17_spill]]  ;;  %s4099_s24 = sld [smem:[#allocation10_spill]] }
 0xc82   : > { %s4100_s25 = sld [smem:[#allocation11_spill]]  ;;  %s4101_s26 = sld [smem:[#allocation13_spill]] }
 0xc83   : > { %s4102_s27 = sld [smem:[#allocation15_spill]]  ;;  %24 = sbr.rel (!%p22_p8) target bundleno = 10 (0xa), region = 140 }
 0xc8a   :  { %2889 = vsyncpa [#allocation3], 1 }
 0xc8b   :  { %2891 = vsyncpa [#allocation3 + $0x1], 1 }

</bundles_post_ra>
